<compile_context>
chip_gen: v7x
topology: tpu7x:2x2x1
jax: 0.10.0
libtpu: 0.0.40
codegen_flags: <defaults>
</compile_context>

<pallas_src>
import functools

import jax
import jax.numpy as jnp
from jax.experimental import pallas as pl
from jax.experimental.pallas import tpu as pltpu


# ---------------------------------------------------------------------------
# Chebyshev basis of the normalized Laplacian (depends only on adj) — plain JAX.
# ---------------------------------------------------------------------------
def cheb_basis(adj):
    # ChebConv.get_laplacian(normalize=True):  L = I - D^{-1/2} A D^{-1/2}
    n = adj.shape[0]
    deg = jnp.sum(adj, axis=-1)
    d_isqrt = jnp.where(deg > 0, jax.lax.rsqrt(jnp.where(deg > 0, deg, 1.0)), 0.0)
    lap = jnp.eye(n, dtype=adj.dtype) - (d_isqrt[:, None] * adj) * d_isqrt[None, :]
    t0 = jnp.eye(n, dtype=adj.dtype)
    t1 = lap
    t2 = 2.0 * jnp.dot(lap, lap, precision=jax.lax.Precision.HIGHEST) - t0  # K=2 -> 3 orders
    return jnp.stack([t0, t1, t2], axis=0)  # [3, N, N]


# ---------------------------------------------------------------------------
# One-time preprocessing (per weights / adjacency update) — hoisted out of the
# per-forward path per the performance review.
# ---------------------------------------------------------------------------
def prepare_constants(adj, params, *, Bb, G):
    cheb = cheb_basis(adj)                                       # [3, N, N] f32

    # Node-mix operator with G batch groups stacked on sublanes: kron(I_G, T_k).
    eye_g = jnp.eye(G, dtype=jnp.float32)
    cheb_bd = jnp.stack([jnp.kron(eye_g, cheb[k]) for k in range(3)])   # [3, G*N, G*N]

    # Channel-mix weights with Bb batch elements stacked on lanes:
    # concat_k kron(I_Bb, W_k)  -> [Bb*Cin, 3*Bb*Cout]  (Bb=4 keeps this tiny: 192 KiB).
    eye_b = jnp.eye(Bb, dtype=jnp.float32)

    def bd_cat(w):   # w: [3, Cin, Cout]
        return jnp.concatenate([jnp.kron(eye_b, w[k]) for k in range(3)], axis=1)

    return {
        "cheb_bd": cheb_bd,
        "w1_bd": bd_cat(params["w1"]).astype(jnp.float32),       # [Bb*C, 3*Bb*H]
        "w2_bd": bd_cat(params["w2"]).astype(jnp.float32),       # [Bb*H, 3*Bb*H]
        "b1": jnp.tile(params["b1"].reshape(1, -1), (1, Bb)).astype(jnp.float32),   # [1, Bb*H]
        "b2": jnp.tile(params["b2"].reshape(1, -1), (1, Bb)).astype(jnp.float32),
        "wt": params["wt"].astype(jnp.float32),                  # [E, H]
        "bt": params["bt"].astype(jnp.float32),                  # [1, H]
    }


# ---------------------------------------------------------------------------
# Pallas kernel: one batch block per grid step.
#   x tile   : [G*N, Bb*C]   (rows = (g, node), lanes = (b, channel))   f32
#   tp tile  : [G*N, Bb*H]   temb projection, pre-broadcast over nodes  f32
#   output   : [G*N, Bb*H]
# All matmuls are f32 in / f32 accumulate on the MXU (no intermediate bf16 rounding).
# ---------------------------------------------------------------------------
def _res_cheb_gc_diff_kernel(x_ref, tp_ref, cheb_ref,
                             w1_ref, b1_ref, w2_ref, b2_ref, o_ref):
    bbh = b1_ref.shape[-1]                      # Bb*H lanes

    def gconv(h, w_bd_ref, b_ref):
        # (1) channel mixing fused over the 3 Chebyshev orders (block-diagonal weight):
        #     [G*N, Bb*C] @ [Bb*C, 3*Bb*H] -> [G*N, 3*Bb*H]
        y = jnp.dot(h, w_bd_ref[...], preferred_element_type=jnp.float32)
        # (2) node mixing with cheb_bd = kron(I_G, T_k); accumulator starts at k=0 and the
        #     three dots form an uninterrupted add chain (bias/ReLU strictly afterwards).
        acc = jnp.dot(cheb_ref[0], y[:, :bbh], preferred_element_type=jnp.float32)
        for k in range(1, 3):
            acc = acc + jnp.dot(cheb_ref[k], y[:, k * bbh:(k + 1) * bbh],
                                preferred_element_type=jnp.float32)
        return jnp.maximum(acc + b_ref[...], 0.0)        # bias + ReLU in f32

    x = x_ref[...]                              # [G*N, Bb*C]

    # --- g1 (dropout p=0.1 after g1 is identity in eval mode) -----------------
    h = gconv(x, w1_ref, b1_ref)
    # TODO(synk): training-mode dropout (p=0.1) not implemented (eval semantics).

    # --- + temb_proj(swish(temb)) (computed outside, already node-broadcast) --
    h = h + tp_ref[...]

    # --- g2, then residual in f32, lane-dense store ----------------------------
    h2 = gconv(h, w2_ref, b2_ref)
    o_ref[...] = x + h2


# ---------------------------------------------------------------------------
# Forward wrapper: layout plumbing (per-call, x/temb dependent) + pallas_call.
# ---------------------------------------------------------------------------
def res_cheb_gc_diff(x, temb, prepared, *, Bb=4, G=8):
    B, N, C = x.shape
    H = prepared["b1"].shape[-1] // Bb
    assert C == H, "residual connection requires in_dim == hid_dim"
    assert (Bb * C) % 128 == 0, "pick Bb so Bb*C is a multiple of 128 (lane-dense)"
    assert (G * N) % 8 == 0, "pick G so G*N is a multiple of 8 (sublane-aligned)"

    step_b = Bb * G                              # batch elements per grid step
    Bp = -(-B // step_b) * step_b
    if Bp != B:                                  # padded elements computed and discarded
        x = jnp.pad(x, ((0, Bp - B), (0, 0), (0, 0)))
        temb = jnp.pad(temb, ((0, Bp - B), (0, 0)))
    S = Bp // step_b

    hp = jax.lax.Precision.HIGHEST

    # temb_proj(swish(temb)) is independent of the graph: tiny plain-XLA matmul, then
    # pre-broadcast over the N node rows into the kernel's node-major layout.
    t = temb * jax.nn.sigmoid(temb)
    tp = jnp.dot(t, prepared["wt"], precision=hp) + prepared["bt"]        # [Bp, H]
    tp_nm = jnp.broadcast_to(tp.reshape(S, G, 1, Bb * H),
                             (S, G, N, Bb * H)).reshape(S * G * N, Bb * H)

    # x layout: rows = (step, g, node), lanes = (b, channel)
    x_nm = (x.reshape(S, G, Bb, N, C)
             .transpose(0, 1, 3, 2, 4)
             .reshape(S * G * N, Bb * C))

    grid_spec = pltpu.PrefetchScalarGridSpec(
        num_scalar_prefetch=0,
        grid=(S,),
        in_specs=[
            pl.BlockSpec((G * N, Bb * C), lambda s: (s, 0)),         # x (node-major, f32)
            pl.BlockSpec((G * N, Bb * H), lambda s: (s, 0)),         # temb projection rows
            pl.BlockSpec((3, G * N, G * N), lambda s: (0, 0, 0)),    # kron(I_G, T_k), resident
            pl.BlockSpec((Bb * C, 3 * Bb * H), lambda s: (0, 0)),    # W1 block-diag cat
            pl.BlockSpec((1, Bb * H), lambda s: (0, 0)),             # b1 (lane-tiled)
            pl.BlockSpec((Bb * H, 3 * Bb * H), lambda s: (0, 0)),    # W2 block-diag cat
            pl.BlockSpec((1, Bb * H), lambda s: (0, 0)),             # b2 (lane-tiled)
        ],
        out_specs=pl.BlockSpec((G * N, Bb * H), lambda s: (s, 0)),   # lane-dense output
    )

    out_nm = pl.pallas_call(
        _res_cheb_gc_diff_kernel,
        out_shape=jax.ShapeDtypeStruct((S * G * N, Bb * H), jnp.float32),
        grid_spec=grid_spec,
        compiler_params=pltpu.CompilerParams(
            dimension_semantics=("parallel",),
            vmem_limit_bytes=32 * 1024 * 1024),
    )(x_nm, tp_nm, prepared["cheb_bd"], prepared["w1_bd"], prepared["b1"],
      prepared["w2_bd"], prepared["b2"])

    # undo layout: [S*G*N, Bb*H] -> [B, N, H]
    out = (out_nm.reshape(S, G, N, Bb, H)
                 .transpose(0, 1, 3, 2, 4)
                 .reshape(Bp, N, H))
    return out[:B]


# ---------------------------------------------------------------------------
# Pure-JAX f32 (HIGHEST-precision) reference for the correctness check.
# ---------------------------------------------------------------------------
def ref_forward(x, temb, adj, p):
    hp = jax.lax.Precision.HIGHEST
    cheb = cheb_basis(adj)

    def gconv(h, w, b):
        lh = jnp.einsum("knm,bmc->kbnc", cheb, h, precision=hp)
        out = jnp.einsum("kbnc,kch->bnh", lh, w, precision=hp) + b
        return jax.nn.relu(out)

    h = gconv(x, p["w1"], p["b1"])
    t = temb * jax.nn.sigmoid(temb)
    tp = jnp.dot(t, p["wt"], precision=hp) + p["bt"]
    h = h + tp[:, None, :]
    h = gconv(h, p["w2"], p["b2"])
    return x + h


if __name__ == "__main__":
    # Small shapes consistent with the module: 16 graph nodes, 32 channels.
    # B=48 is deliberately NOT a multiple of the 32-element batch step -> exercises padding.
    B, N = 48, 16
    in_dim = hid_dim = emd_dim = 32
    Bb, G = 4, 8          # lanes = Bb*C = 128, rows = G*N = 128, 32 batch elems / grid step

    key = jax.random.PRNGKey(0)
    k_x, k_t, k_w1, k_wt, k_w2, k_b1, k_bt, k_b2 = jax.random.split(key, 8)

    # Deterministic symmetric adjacency with self loops (ring graph).
    eye = jnp.eye(N, dtype=jnp.float32)
    ring = jnp.roll(eye, 1, axis=1) + jnp.roll(eye, -1, axis=1)
    adj = eye + ring

    x = jax.random.normal(k_x, (B, N, in_dim), dtype=jnp.float32)
    temb = jax.random.normal(k_t, (B, emd_dim), dtype=jnp.float32)

    def xavier(k, shape, fan_in, fan_out):
        scale = jnp.sqrt(2.0 / (fan_in + fan_out))
        return scale * jax.random.normal(k, shape, dtype=jnp.float32)

    params = {
        "w1": xavier(k_w1, (3, in_dim, hid_dim), in_dim, hid_dim),    # ChebConv g1 weight
        "b1": 0.1 * jax.random.normal(k_b1, (1, hid_dim), dtype=jnp.float32),
        "wt": xavier(k_wt, (emd_dim, hid_dim), emd_dim, hid_dim),     # temb_proj weight (W^T)
        "bt": 0.1 * jax.random.normal(k_bt, (1, hid_dim), dtype=jnp.float32),
        "w2": xavier(k_w2, (3, hid_dim, hid_dim), hid_dim, hid_dim),  # ChebConv g2 weight
        "b2": 0.1 * jax.random.normal(k_b2, (1, hid_dim), dtype=jnp.float32),
    }

    # One-time preprocessing (hoisted out of the per-forward path), then the jitted forward.
    prepared = prepare_constants(adj, params, Bb=Bb, G=G)
    fwd = jax.jit(functools.partial(res_cheb_gc_diff, Bb=Bb, G=G))

    out = jax.block_until_ready(fwd(x, temb, prepared))
    ref = jax.block_until_ready(ref_forward(x, temb, adj, params))

    assert out.shape == (B, N, hid_dim)
    # All kernel math is f32 (no bf16 intermediate rounding anymore); the tolerance only
    # absorbs MXU f32-pass rounding differences vs the HIGHEST-precision XLA reference.
    max_diff = float(jnp.max(jnp.abs(out - ref)))
    assert jnp.allclose(out, ref, rtol=2e-2, atol=2e-2), \
        f"mismatch vs reference: max abs diff {max_diff}"

    print("KERNEL_OK")
</pallas_src>

<mosaic_0001>
module attributes {stable_mosaic.version = 11 : i64} {
  func.func @_res_cheb_gc_diff_kernel(%arg0: i32, %arg1: memref<128x128xf32, #tpu.memory_space<vmem>>, %arg2: memref<128x128xf32, #tpu.memory_space<vmem>>, %arg3: memref<3x128x128xf32, #tpu.memory_space<vmem>>, %arg4: memref<128x384xf32, #tpu.memory_space<vmem>>, %arg5: memref<1x128xf32, #tpu.memory_space<vmem>>, %arg6: memref<128x384xf32, #tpu.memory_space<vmem>>, %arg7: memref<1x128xf32, #tpu.memory_space<vmem>>, %arg8: memref<128x128xf32, #tpu.memory_space<vmem>>) attributes {dimension_semantics = [#tpu.dimension_semantics<parallel>], iteration_bounds = array<i64: 2>, scalar_prefetch = 0 : i64, scratch_operands = 0 : i64, tpu.core_type = #tpu.core_type<tc>, window_params = [{transform_indices = @transform_0, window_bounds = array<i64: 128, 128>}, {transform_indices = @transform_1, window_bounds = array<i64: 128, 128>}, {pipeline_mode = #tpu.pipeline_mode<synchronous>, transform_indices = @transform_2, window_bounds = array<i64: 3, 128, 128>}, {pipeline_mode = #tpu.pipeline_mode<synchronous>, transform_indices = @transform_3, window_bounds = array<i64: 128, 384>}, {pipeline_mode = #tpu.pipeline_mode<synchronous>, transform_indices = @transform_4, window_bounds = array<i64: 1, 128>}, {pipeline_mode = #tpu.pipeline_mode<synchronous>, transform_indices = @transform_5, window_bounds = array<i64: 128, 384>}, {pipeline_mode = #tpu.pipeline_mode<synchronous>, transform_indices = @transform_6, window_bounds = array<i64: 1, 128>}, {transform_indices = @transform_7, window_bounds = array<i64: 128, 128>}]} {
    %c0 = arith.constant 0 : index
    %c0_0 = arith.constant 0 : index
    %0 = vector.load %arg1[%c0, %c0_0] : memref<128x128xf32, #tpu.memory_space<vmem>>, vector<128x128xf32>
    %c0_1 = arith.constant 0 : index
    %c0_2 = arith.constant 0 : index
    %1 = vector.load %arg4[%c0_1, %c0_2] : memref<128x384xf32, #tpu.memory_space<vmem>>, vector<128x384xf32>
    %cst = arith.constant dense<0.000000e+00> : vector<128x384xf32>
    %2 = tpu.matmul %0, %1, %cst {dimension_numbers = #tpu.dot_dimension_numbers<[1], [0], [0], [1], [0, 0, 1, 1], [], []>} : vector<128x128xf32>, vector<128x384xf32>, vector<128x384xf32> -> vector<128x384xf32>
    %c0_3 = arith.constant 0 : index
    %c0_4 = arith.constant 0 : index
    %c0_5 = arith.constant 0 : index
    %3 = vector.load %arg3[%c0_3, %c0_4, %c0_5] : memref<3x128x128xf32, #tpu.memory_space<vmem>>, vector<1x128x128xf32>
    %4 = vector.shape_cast %3 : vector<1x128x128xf32> to vector<128x128xf32>
    %5 = vector.extract_strided_slice %2 {offsets = [0, 0], sizes = [128, 128], strides = [1, 1]} : vector<128x384xf32> to vector<128x128xf32>
    %cst_6 = arith.constant dense<0.000000e+00> : vector<128x128xf32>
    %6 = tpu.matmul %4, %5, %cst_6 {dimension_numbers = #tpu.dot_dimension_numbers<[1], [0], [0], [1], [0, 0, 1, 1], [], []>} : vector<128x128xf32>, vector<128x128xf32>, vector<128x128xf32> -> vector<128x128xf32>
    %c1 = arith.constant 1 : index
    %c0_7 = arith.constant 0 : index
    %c0_8 = arith.constant 0 : index
    %7 = vector.load %arg3[%c1, %c0_7, %c0_8] : memref<3x128x128xf32, #tpu.memory_space<vmem>>, vector<1x128x128xf32>
    %8 = vector.shape_cast %7 : vector<1x128x128xf32> to vector<128x128xf32>
    %9 = vector.extract_strided_slice %2 {offsets = [0, 128], sizes = [128, 128], strides = [1, 1]} : vector<128x384xf32> to vector<128x128xf32>
    %cst_9 = arith.constant dense<0.000000e+00> : vector<128x128xf32>
    %10 = tpu.matmul %8, %9, %cst_9 {dimension_numbers = #tpu.dot_dimension_numbers<[1], [0], [0], [1], [0, 0, 1, 1], [], []>} : vector<128x128xf32>, vector<128x128xf32>, vector<128x128xf32> -> vector<128x128xf32>
    %11 = arith.addf %6, %10 : vector<128x128xf32>
    %c2 = arith.constant 2 : index
    %c0_10 = arith.constant 0 : index
    %c0_11 = arith.constant 0 : index
    %12 = vector.load %arg3[%c2, %c0_10, %c0_11] : memref<3x128x128xf32, #tpu.memory_space<vmem>>, vector<1x128x128xf32>
    %13 = vector.shape_cast %12 : vector<1x128x128xf32> to vector<128x128xf32>
    %14 = vector.extract_strided_slice %2 {offsets = [0, 256], sizes = [128, 128], strides = [1, 1]} : vector<128x384xf32> to vector<128x128xf32>
    %cst_12 = arith.constant dense<0.000000e+00> : vector<128x128xf32>
    %15 = tpu.matmul %13, %14, %cst_12 {dimension_numbers = #tpu.dot_dimension_numbers<[1], [0], [0], [1], [0, 0, 1, 1], [], []>} : vector<128x128xf32>, vector<128x128xf32>, vector<128x128xf32> -> vector<128x128xf32>
    %16 = arith.addf %11, %15 : vector<128x128xf32>
    %c0_13 = arith.constant 0 : index
    %c0_14 = arith.constant 0 : index
    %17 = vector.load %arg5[%c0_13, %c0_14] : memref<1x128xf32, #tpu.memory_space<vmem>>, vector<1x128xf32>
    %18 = vector.broadcast %17 : vector<1x128xf32> to vector<128x128xf32>
    %19 = arith.addf %16, %18 : vector<128x128xf32>
    %cst_15 = arith.constant 0.000000e+00 : f32
    %20 = vector.broadcast %cst_15 : f32 to vector<128x128xf32>
    %21 = arith.maximumf %19, %20 : vector<128x128xf32>
    %c0_16 = arith.constant 0 : index
    %c0_17 = arith.constant 0 : index
    %22 = vector.load %arg2[%c0_16, %c0_17] : memref<128x128xf32, #tpu.memory_space<vmem>>, vector<128x128xf32>
    %23 = arith.addf %21, %22 : vector<128x128xf32>
    %c0_18 = arith.constant 0 : index
    %c0_19 = arith.constant 0 : index
    %24 = vector.load %arg6[%c0_18, %c0_19] : memref<128x384xf32, #tpu.memory_space<vmem>>, vector<128x384xf32>
    %cst_20 = arith.constant dense<0.000000e+00> : vector<128x384xf32>
    %25 = tpu.matmul %23, %24, %cst_20 {dimension_numbers = #tpu.dot_dimension_numbers<[1], [0], [0], [1], [0, 0, 1, 1], [], []>} : vector<128x128xf32>, vector<128x384xf32>, vector<128x384xf32> -> vector<128x384xf32>
    %c0_21 = arith.constant 0 : index
    %c0_22 = arith.constant 0 : index
    %c0_23 = arith.constant 0 : index
    %26 = vector.load %arg3[%c0_21, %c0_22, %c0_23] : memref<3x128x128xf32, #tpu.memory_space<vmem>>, vector<1x128x128xf32>
    %27 = vector.shape_cast %26 : vector<1x128x128xf32> to vector<128x128xf32>
    %28 = vector.extract_strided_slice %25 {offsets = [0, 0], sizes = [128, 128], strides = [1, 1]} : vector<128x384xf32> to vector<128x128xf32>
    %cst_24 = arith.constant dense<0.000000e+00> : vector<128x128xf32>
    %29 = tpu.matmul %27, %28, %cst_24 {dimension_numbers = #tpu.dot_dimension_numbers<[1], [0], [0], [1], [0, 0, 1, 1], [], []>} : vector<128x128xf32>, vector<128x128xf32>, vector<128x128xf32> -> vector<128x128xf32>
    %c1_25 = arith.constant 1 : index
    %c0_26 = arith.constant 0 : index
    %c0_27 = arith.constant 0 : index
    %30 = vector.load %arg3[%c1_25, %c0_26, %c0_27] : memref<3x128x128xf32, #tpu.memory_space<vmem>>, vector<1x128x128xf32>
    %31 = vector.shape_cast %30 : vector<1x128x128xf32> to vector<128x128xf32>
    %32 = vector.extract_strided_slice %25 {offsets = [0, 128], sizes = [128, 128], strides = [1, 1]} : vector<128x384xf32> to vector<128x128xf32>
    %cst_28 = arith.constant dense<0.000000e+00> : vector<128x128xf32>
    %33 = tpu.matmul %31, %32, %cst_28 {dimension_numbers = #tpu.dot_dimension_numbers<[1], [0], [0], [1], [0, 0, 1, 1], [], []>} : vector<128x128xf32>, vector<128x128xf32>, vector<128x128xf32> -> vector<128x128xf32>
    %34 = arith.addf %29, %33 : vector<128x128xf32>
    %c2_29 = arith.constant 2 : index
    %c0_30 = arith.constant 0 : index
    %c0_31 = arith.constant 0 : index
    %35 = vector.load %arg3[%c2_29, %c0_30, %c0_31] : memref<3x128x128xf32, #tpu.memory_space<vmem>>, vector<1x128x128xf32>
    %36 = vector.shape_cast %35 : vector<1x128x128xf32> to vector<128x128xf32>
    %37 = vector.extract_strided_slice %25 {offsets = [0, 256], sizes = [128, 128], strides = [1, 1]} : vector<128x384xf32> to vector<128x128xf32>
    %cst_32 = arith.constant dense<0.000000e+00> : vector<128x128xf32>
    %38 = tpu.matmul %36, %37, %cst_32 {dimension_numbers = #tpu.dot_dimension_numbers<[1], [0], [0], [1], [0, 0, 1, 1], [], []>} : vector<128x128xf32>, vector<128x128xf32>, vector<128x128xf32> -> vector<128x128xf32>
    %39 = arith.addf %34, %38 : vector<128x128xf32>
    %c0_33 = arith.constant 0 : index
    %c0_34 = arith.constant 0 : index
    %40 = vector.load %arg7[%c0_33, %c0_34] : memref<1x128xf32, #tpu.memory_space<vmem>>, vector<1x128xf32>
    %41 = vector.broadcast %40 : vector<1x128xf32> to vector<128x128xf32>
    %42 = arith.addf %39, %41 : vector<128x128xf32>
    %cst_35 = arith.constant 0.000000e+00 : f32
    %43 = vector.broadcast %cst_35 : f32 to vector<128x128xf32>
    %44 = arith.maximumf %42, %43 : vector<128x128xf32>
    %45 = arith.addf %0, %44 : vector<128x128xf32>
    %c0_36 = arith.constant 0 : index
    %c0_37 = arith.constant 0 : index
    %46 = vector.load %arg8[%c0_36, %c0_37] : memref<128x128xf32, #tpu.memory_space<vmem>>, vector<128x128xf32>
    tpu.vector_store %arg8[%c0_36, %c0_37], %45 {strides = array<i32>} : memref<128x128xf32, #tpu.memory_space<vmem>>, vector<128x128xf32>,
    return
  }
  func.func @transform_0(%arg0: i32) -> (i32, i32) {
    %c0_i32 = arith.constant 0 : i32
    %c0_i32_0 = arith.constant 0 : i32
    return %arg0, %c0_i32 : i32, i32
  }
  func.func @transform_1(%arg0: i32) -> (i32, i32) {
    %c0_i32 = arith.constant 0 : i32
    %c0_i32_0 = arith.constant 0 : i32
    return %arg0, %c0_i32 : i32, i32
  }
  func.func @transform_2(%arg0: i32) -> (i32, i32, i32) {
    %c0_i32 = arith.constant 0 : i32
    %c0_i32_0 = arith.constant 0 : i32
    %c0_i32_1 = arith.constant 0 : i32
    %c0_i32_2 = arith.constant 0 : i32
    return %c0_i32, %c0_i32_0, %c0_i32_1 : i32, i32, i32
  }
  func.func @transform_3(%arg0: i32) -> (i32, i32) {
    %c0_i32 = arith.constant 0 : i32
    %c0_i32_0 = arith.constant 0 : i32
    %c0_i32_1 = arith.constant 0 : i32
    return %c0_i32, %c0_i32_0 : i32, i32
  }
  func.func @transform_4(%arg0: i32) -> (i32, i32) {
    %c0_i32 = arith.constant 0 : i32
    %c0_i32_0 = arith.constant 0 : i32
    %c0_i32_1 = arith.constant 0 : i32
    return %c0_i32, %c0_i32_0 : i32, i32
  }
  func.func @transform_5(%arg0: i32) -> (i32, i32) {
    %c0_i32 = arith.constant 0 : i32
    %c0_i32_0 = arith.constant 0 : i32
    %c0_i32_1 = arith.constant 0 : i32
    return %c0_i32, %c0_i32_0 : i32, i32
  }
  func.func @transform_6(%arg0: i32) -> (i32, i32) {
    %c0_i32 = arith.constant 0 : i32
    %c0_i32_0 = arith.constant 0 : i32
    %c0_i32_1 = arith.constant 0 : i32
    return %c0_i32, %c0_i32_0 : i32, i32
  }
  func.func @transform_7(%arg0: i32) -> (i32, i32) {
    %c0_i32 = arith.constant 0 : i32
    %c0_i32_0 = arith.constant 0 : i32
    return %arg0, %c0_i32 : i32, i32
  }
}

</mosaic_0001>

<bundles_post_ra>
// kernel: res_cheb_gc_diff.1
= control target key start
LH: loop header
LB: loop body
LE: loop exit
PB: predicated region body
PF: predicated region fallthrough
CT: control target
= control target key end

     0   :  { %s3399_s24 = smov 0   ;;  %s4298_s0 = inlined_call_operand.vmem [shape: f32[256,128], index: 0, kind: input, shape index: {}]   ;;  %s4299_s1 = inlined_call_operand.vmem [shape: f32[256,128], index: 1, kind: input, shape index: {}]   ;;  %s4300_s2 = inlined_call_operand.vmem [shape: f32[3,128,128], index: 2, kind: input, shape index: {}]   ;;  %s4301_s3 = inlined_call_operand.vmem [shape: f32[128,384], index: 3, kind: input, shape index: {}]   ;;  %s4302_s4 = inlined_call_operand.vmem [shape: f32[1,128], index: 4, kind: input, shape index: {}]   ;;  %s4303_s5 = inlined_call_operand.vmem [shape: f32[128,384], index: 5, kind: input, shape index: {}]   ;;  %s4304_s6 = inlined_call_operand.vmem [shape: f32[1,128], index: 6, kind: input, shape index: {}]   ;;  %s4305_s7 = inlined_call_operand.vmem [shape: f32[256,128], index: 7, kind: output, shape index: {}]  }
   0x1 LB: > { %s2190_s25 = sadd.s32 4294967295, %s3356_s24   ;;  %p2194_p0 = scmp.ge.s32.totalorder %s3356_s24, 1  ;;  %s3356_s24 = sphi %s3399_s24, %s17_s24  }
   0x2   : > { %p249_p1 = scmp.lt.s32.totalorder %s3356_s24, 3 }
   0x4   : > { %p250_p2 = pnand %p2194_p0, %p249_p1 }
   0x6   : > { %253 = sbr.rel (%p250_p2) target bundleno = 1201 (0x4b1), region = 48 }
   0xd   : > { %v321_v0 = vld [vmem:[%s4301_s3 + $0x8] sm:$0xff]  ;;  %v324_v1 = vld [vmem:[%s4301_s3 + $0x20] sm:$0xff]  ;;  %v323_v4 = vld [vmem:[%s4301_s3 + $0x18] sm:$0xff]  ;;  %v4306_v7 = vmov 0.0   ;;  %s2195_s28 = sshll.u32 %s2190_s25, 4 }
   0xe   : > { %v320_v2 = vld [vmem:[%s4301_s3] sm:$0xff]  ;;  %v2941_v3 = vpack.c.bf16 %v324_v1, %v321_v0  ;;  %v327_v5 = vld [vmem:[%s4301_s3 + $0x38] sm:$0xff]  ;;  %v330_v6 = vld [vmem:[%s4301_s3 + $0x50] sm:$0xff]  ;;  %432 = vmatprep.mubr.f32.mxu0 %v4306_v7  ;;  %p287_p3 = scmp.lt.s32.totalorder %s2195_s28, 31 }
   0xf   : > { %v2943_v8 = vpack.c.bf16 %v323_v4, %v320_v2  ;;  %v2945_v9 = vpack.c.bf16 %v330_v6, %v327_v5  ;;  %v326_v10 = vld [vmem:[%s4301_s3 + $0x30] sm:$0xff]  ;;  %v329_v11 = vld [vmem:[%s4301_s3 + $0x48] sm:$0xff]  ;;  %v336_v13 = vld [vmem:[%s4301_s3 + $0x80] sm:$0xff] }
  0x10   : > { %v333_v12 = vld [vmem:[%s4301_s3 + $0x68] sm:$0xff]  ;;  %2942 = vmatprep.subr.bf16.mxu0 %v2941_v3  ;;  %v2947_v14 = vpack.c.bf16 %v329_v11, %v326_v10  ;;  %v332_v16 = vld [vmem:[%s4301_s3 + $0x60] sm:$0xff]  ;;  %v335_v17 = vld [vmem:[%s4301_s3 + $0x78] sm:$0xff]  ;;  %s4352_s28 = smov (!%p287_p3, %s2195_s28), 31 }
  0x11   : > { %2944 = vmatpush1.bf16.msra.mxu0 %v2943_v8  ;;  %v2949_v15 = vpack.c.bf16 %v336_v13, %v333_v12  ;;  %v339_v18 = vld [vmem:[%s4301_s3 + $0x98] sm:$0xff]  ;;  %v342_v19 = vld [vmem:[%s4301_s3 + $0xb0] sm:$0xff]  ;;  %v2951_v20 = vpack.c.bf16 %v335_v17, %v332_v16  ;;  %v341_v23 = vld [vmem:[%s4301_s3 + $0xa8] sm:$0xff]  ;;  %s3506_s27 = sshll.u32 %s4352_s28, 3 }
  0x12   : > { %2946 = vmatprep.subr.bf16.mxu0 %v2945_v9  ;;  %v2953_v21 = vpack.c.bf16 %v342_v19, %v339_v18  ;;  %v338_v22 = vld [vmem:[%s4301_s3 + $0x90] sm:$0xff]  ;;  %v345_v24 = vld [vmem:[%s4301_s3 + $0xc8] sm:$0xff]  ;;  %v348_v25 = vld [vmem:[%s4301_s3 + $0xe0] sm:$0xff]  ;;  %s3518_s12 = scalar_lea.vmem %s4298_s0, %s3506_s27  ;;  %s4050_s8 = scalar_lea.vmem %s4299_s1, %s3506_s27 }
  0x13   : > { %v2955_v26 = vpack.c.bf16 %v341_v23, %v338_v22  ;;  %v2957_v27 = vpack.c.bf16 %v348_v25, %v345_v24  ;;  %v344_v28 = vld [vmem:[%s4301_s3 + $0xc0] sm:$0xff]  ;;  %v347_v29 = vld [vmem:[%s4301_s3 + $0xd8] sm:$0xff]  ;;  %v354_v31 = vld [vmem:[%s4301_s3 + $0x110] sm:$0xff]  ;;  %s4247_s20 = scalar_lea.vmem %s4305_s7, %s3506_s27 }
  0x14   : > { %v351_v30 = vld [vmem:[%s4301_s3 + $0xf8] sm:$0xff]  ;;  %v2959_v32 = vpack.c.bf16 %v347_v29, %v344_v28  ;;  %v350_v34 = vld [vmem:[%s4301_s3 + $0xf0] sm:$0xff]  ;;  %v353_v35 = vld [vmem:[%s4301_s3 + $0x108] sm:$0xff] }
  0x15   : > { %2948 = vmatpush1.bf16.msra.mxu0 %v2947_v14  ;;  %v2961_v33 = vpack.c.bf16 %v354_v31, %v351_v30  ;;  %v357_v36 = vld [vmem:[%s4301_s3 + $0x128] sm:$0xff]  ;;  %v360_v37 = vld [vmem:[%s4301_s3 + $0x140] sm:$0xff]  ;;  %v2963_v38 = vpack.c.bf16 %v353_v35, %v350_v34  ;;  %v359_v41 = vld [vmem:[%s4301_s3 + $0x138] sm:$0xff] }
  0x16   : > { %2950 = vmatprep.subr.bf16.mxu0 %v2949_v15  ;;  %v2965_v39 = vpack.c.bf16 %v360_v37, %v357_v36  ;;  %v356_v40 = vld [vmem:[%s4301_s3 + $0x120] sm:$0xff]  ;;  %v363_v42 = vld [vmem:[%s4301_s3 + $0x158] sm:$0xff]  ;;  %v366_v43 = vld [vmem:[%s4301_s3 + $0x170] sm:$0xff] }
  0x17   : > { %v2967_v44 = vpack.c.bf16 %v359_v41, %v356_v40  ;;  %v2969_v45 = vpack.c.bf16 %v366_v43, %v363_v42  ;;  %v362_v46 = vld [vmem:[%s4301_s3 + $0x150] sm:$0xff]  ;;  %v365_v47 = vld [vmem:[%s4301_s3 + $0x168] sm:$0xff]  ;;  %v328_v52 = vld [vmem:[%s4301_s3 + $0x40] sm:$0xff] }
  0x18   : > { %v322_v48 = vld [vmem:[%s4301_s3 + $0x10] sm:$0xff]  ;;  %v325_v49 = vld [vmem:[%s4301_s3 + $0x28] sm:$0xff]  ;;  %v2971_v50 = vpack.c.bf16 %v365_v47, %v362_v46  ;;  %v331_v53 = vld [vmem:[%s4301_s3 + $0x58] sm:$0xff] }
  0x19   : > { %2952 = vmatpush1.bf16.msra.mxu0 %v2951_v20  ;;  %v2973_v51 = vpack.c.bf16 %v325_v49, %v322_v48  ;;  %v3527_v54 = vld [vmem:[%s3518_s12] sm:$0xff]  ;;  %v2977_v55 = vpack.c.bf16 %v331_v53, %v328_v52  ;;  %v334_v56 = vld [vmem:[%s4301_s3 + $0x70] sm:$0xff]  ;;  %v337_v57 = vld [vmem:[%s4301_s3 + $0x88] sm:$0xff] }
  0x1a   : > { %2954 = vmatprep.subr.bf16.mxu0 %v2953_v21  ;;  %v3538_v58 = vld [vmem:[%s3518_s12 + $0x8] sm:$0xff]  ;;  %v2981_v59 = vpack.c.bf16 %v337_v57, %v334_v56  ;;  %v340_v60 = vld [vmem:[%s4301_s3 + $0xa0] sm:$0xff]  ;;  %v343_v61 = vld [vmem:[%s4301_s3 + $0xb8] sm:$0xff] }
  0x1b   : > { %v3549_v62 = vld [vmem:[%s3518_s12 + $0x10] sm:$0xff]  ;;  %v2985_v63 = vpack.c.bf16 %v343_v61, %v340_v60  ;;  %v349_v1 = vld [vmem:[%s4301_s3 + $0xe8] sm:$0xff]  ;;  %v307_v2 = vld [vmem:[%s3518_s12 + $0x18] sm:$0xff] }
  0x1c   : > { %v346_v0 = vld [vmem:[%s4301_s3 + $0xd0] sm:$0xff]  ;;  %v352_v4 = vld [vmem:[%s4301_s3 + $0x100] sm:$0xff]  ;;  %v355_v5 = vld [vmem:[%s4301_s3 + $0x118] sm:$0xff] }
  0x1d   : > { %2956 = vmatpush1.bf16.msra.mxu0 %v2955_v26  ;;  %v2989_v3 = vpack.c.bf16 %v349_v1, %v346_v0  ;;  %v308_v6 = vld [vmem:[%s3518_s12 + $0x20] sm:$0xff]  ;;  %v2993_v8 = vpack.c.bf16 %v355_v5, %v352_v4  ;;  %v358_v9 = vld [vmem:[%s4301_s3 + $0x130] sm:$0xff]  ;;  %v361_v10 = vld [vmem:[%s4301_s3 + $0x148] sm:$0xff] }
  0x1e   : > { %2958 = vmatprep.subr.bf16.mxu0 %v2957_v27  ;;  %v309_v11 = vld [vmem:[%s3518_s12 + $0x28] sm:$0xff]  ;;  %v2997_v12 = vpack.c.bf16 %v361_v10, %v358_v9  ;;  %v364_v13 = vld [vmem:[%s4301_s3 + $0x160] sm:$0xff]  ;;  %v367_v14 = vld [vmem:[%s4301_s3 + $0x178] sm:$0xff] }
  0x1f   : > { %v310_v15 = vld [vmem:[%s3518_s12 + $0x30] sm:$0xff]  ;;  %v3001_v16 = vpack.c.bf16 %v367_v14, %v364_v13  ;;  %v311_v17 = vld [vmem:[%s3518_s12 + $0x38] sm:$0xff]  ;;  %v312_v18 = vld [vmem:[%s3518_s12 + $0x40] sm:$0xff] }
  0x20   : > { %v313_v19 = vld [vmem:[%s3518_s12 + $0x48] sm:$0xff]  ;;  %v314_v20 = vld [vmem:[%s3518_s12 + $0x50] sm:$0xff]  ;;  %v315_v21 = vld [vmem:[%s3518_s12 + $0x58] sm:$0xff] }
  0x21   : > { %2960 = vmatpush1.bf16.msra.mxu0 %v2959_v32  ;;  %v316_v22 = vld [vmem:[%s3518_s12 + $0x60] sm:$0xff]  ;;  %v317_v23 = vld [vmem:[%s3518_s12 + $0x68] sm:$0xff]  ;;  %v318_v24 = vld [vmem:[%s3518_s12 + $0x70] sm:$0xff] }
  0x22   : > { %2962 = vmatprep.subr.bf16.mxu0 %v2961_v33  ;;  %v319_v25 = vld [vmem:[%s3518_s12 + $0x78] sm:$0xff]  ;;  %v3609_v26 = vld [vmem:[%s4300_s2 + $0x80] sm:$0xff]  ;;  %v1247_v52 = vld [vmem:[%s4303_s5 + $0x8] sm:$0xff] }
  0x23   : > { %2581 = vmatprep.mubr.f32.mxu1 %v3609_v26  ;;  %v1250_v53 = vld [vmem:[%s4303_s5 + $0x20] sm:$0xff]  ;;  %v1249_v57 = vld [vmem:[%s4303_s5 + $0x18] sm:$0xff]  ;;  %v1259_v0 = vld [vmem:[%s4303_s5 + $0x68] sm:$0xff] }
  0x24   : > { %v3101_v56 = vpack.c.bf16 %v1250_v53, %v1247_v52  ;;  %v1262_v1 = vld [vmem:[%s4303_s5 + $0x80] sm:$0xff]  ;;  %v1261_v9 = vld [vmem:[%s4303_s5 + $0x78] sm:$0xff] }
  0x25   : > { %2964 = vmatpush1.bf16.msra.mxu0 %v2963_v38 }
  0x26   : > { %2966 = vmatprep.subr.bf16.mxu0 %v2965_v39 }
  0x29   : > { %2968 = vmatpush1.bf16.msra.mxu0 %v2967_v44 }
  0x2a   : > { %2970 = vmatprep.subr.bf16.mxu0 %v2969_v45 }
  0x2d   : > { %2972 = vmatpush1.bf16.msra.mxu0 %v2971_v50 }
  0x2e   : > { %2974 = vmatprep.subr.bf16.mxu0 %v2973_v51 }
  0x30   : > { %433 = vmatmul.mubr.f32.vlgmr.msra.gmra.mrb[0].mxu0 %v3527_v54 }
  0x31   : > { %438 = vmatprep.mubr.f32.mxu0 %v4306_v7  ;;  %2976 = vmatpush3.bf16.msra.mxu0 %v2973_v51 }
  0x32   : > { %2978 = vmatprep.subr.bf16.mxu0 %v2977_v55 }
  0x34   : > { %439 = vmatmul.mubr.f32.gmra.mrb[2].mxu0 %v3538_v58 }
  0x35   : > { %444 = vmatprep.mubr.f32.mxu0 %v4306_v7  ;;  %2980 = vmatpush3.bf16.msra.mxu0 %v2977_v55 }
  0x36   : > { %2982 = vmatprep.subr.bf16.mxu0 %v2981_v59 }
  0x38   : > { %445 = vmatmul.mubr.f32.gmra.mrb[4].mxu0 %v3549_v62 }
  0x39   : > { %450 = vmatprep.mubr.f32.mxu0 %v4306_v7  ;;  %2984 = vmatpush3.bf16.msra.mxu0 %v2981_v59  ;;  %v1256_v59 = vld [vmem:[%s4303_s5 + $0x50] sm:$0xff] }
  0x3a   : > { %2986 = vmatprep.subr.bf16.mxu0 %v2985_v63 }
  0x3c   : > { %451 = vmatmul.mubr.f32.gmra.mrb[6].mxu0 %v307_v2 }
  0x3d   : > { %456 = vmatprep.mubr.f32.mxu0 %v4306_v7  ;;  %2988 = vmatpush3.bf16.msra.mxu0 %v2985_v63  ;;  %v1255_v63 = vld [vmem:[%s4303_s5 + $0x48] sm:$0xff] }
  0x3e   : > { %2990 = vmatprep.subr.bf16.mxu0 %v2989_v3 }
  0x40   : > { %457 = vmatmul.mubr.f32.gmra.mrb[8].mxu0 %v308_v6 }
  0x41   : > { %462 = vmatprep.mubr.f32.mxu0 %v4306_v7  ;;  %2992 = vmatpush3.bf16.msra.mxu0 %v2989_v3 }
  0x42   : > { %2994 = vmatprep.subr.bf16.mxu0 %v2993_v8 }
  0x44   : > { %463 = vmatmul.mubr.f32.gmra.mrb[10].mxu0 %v309_v11 }
  0x45   : > { %468 = vmatprep.mubr.f32.mxu0 %v4306_v7  ;;  %2996 = vmatpush3.bf16.msra.mxu0 %v2993_v8  ;;  %v1258_v8 = vld [vmem:[%s4303_s5 + $0x60] sm:$0xff] }
  0x46   : > { %2998 = vmatprep.subr.bf16.mxu0 %v2997_v12  ;;  %v3111_v14 = vpack.c.bf16 %v1261_v9, %v1258_v8 }
  0x48   : > { %469 = vmatmul.mubr.f32.gmra.mrb[12].mxu0 %v310_v15 }
  0x49   : > { %474 = vmatprep.mubr.f32.mxu0 %v4306_v7  ;;  %3000 = vmatpush3.bf16.msra.mxu0 %v2997_v12  ;;  %v1268_v12 = vld [vmem:[%s4303_s5 + $0xb0] sm:$0xff] }
  0x4a   : > { %3002 = vmatprep.subr.bf16.mxu0 %v3001_v16 }
  0x4c   : > { %475 = vmatmul.mubr.f32.gmra.mrb[14].mxu0 %v311_v17 }
  0x4d   : > { %480 = vmatprep.mubr.f32.mxu0 %v4306_v7  ;;  %3004 = vmatpush3.bf16.msra.mxu0 %v3001_v16 }
  0x4e   : > { %3102 = vmatprep.subr.bf16.mxu0 %v3101_v56  ;;  %v3709_v56 = vld [vmem:[%s4300_s2 + $0x90] sm:$0xff] }
  0x50   : > { %481 = vmatmul.mubr.f32.gmra.mrb[16].mxu0 %v312_v18 }
  0x51   : > { %486 = vmatprep.mubr.f32.mxu0 %v4306_v7 }
  0x54   : > { %487 = vmatmul.mubr.f32.gmra.mrb[18].mxu0 %v313_v19 }
  0x55   : > { %492 = vmatprep.mubr.f32.mxu0 %v4306_v7 }
  0x58   : > { %493 = vmatmul.mubr.f32.gmra.mrb[20].mxu0 %v314_v20 }
  0x59   : > { %498 = vmatprep.mubr.f32.mxu0 %v4306_v7 }
  0x5c   : > { %499 = vmatmul.mubr.f32.gmra.mrb[22].mxu0 %v315_v21 }
  0x5d   : > { %504 = vmatprep.mubr.f32.mxu0 %v4306_v7 }
  0x60   : > { %505 = vmatmul.mubr.f32.gmra.mrb[24].mxu0 %v316_v22 }
  0x61   : > { %510 = vmatprep.mubr.f32.mxu0 %v4306_v7 }
  0x64   : > { %511 = vmatmul.mubr.f32.gmra.mrb[26].mxu0 %v317_v23 }
  0x65   : > { %516 = vmatprep.mubr.f32.mxu0 %v4306_v7 }
  0x68   : > { %517 = vmatmul.mubr.f32.gmra.mrb[28].mxu0 %v318_v24 }
  0x69   : > { %522 = vmatprep.mubr.f32.mxu0 %v4306_v7 }
  0x6c   : > { %523 = vmatmul.mubr.f32.gmra.mrb[30].mxu0 %v319_v25 }
  0x6d   : > { %2525 = vmatprep.mubr.f32.mxu0 %v3527_v54  ;;  %v1246_v54 = vld [vmem:[%s4303_s5] sm:$0xff] }
  0x6e   : > { %v3103_v60 = vpack.c.bf16 %v1249_v57, %v1246_v54  ;;  %v3703_v54 = vld [vmem:[%s4300_s2 + $0x88] sm:$0xff] }
  0x70   : > { %2526 = vmatmul.mubr.f32.vlgmr.msra.gmra.mrb[32].mxu0 %v3538_v58  ;;  %v1253_v58 = vld [vmem:[%s4303_s5 + $0x38] sm:$0xff] }
  0x71   : > { %2528 = vmatprep.mubr.f32.mxu0 %v3549_v62  ;;  %v3105_v61 = vpack.c.bf16 %v1256_v59, %v1253_v58  ;;  %v1252_v62 = vld [vmem:[%s4303_s5 + $0x30] sm:$0xff]  ;;  %3104 = vmatpush1.bf16.msra.mxu0 %v3103_v60  ;;  %v3719_v59 = vld [vmem:[%s4300_s2 + $0x98] sm:$0xff] }
  0x72   : > { %v3107_v3 = vpack.c.bf16 %v1255_v63, %v1252_v62  ;;  %v3735_v63 = vld [vmem:[%s4300_s2 + $0xa8] sm:$0xff] }
  0x73   : > { %3106 = vmatprep.subr.bf16.mxu0 %v3105_v61  ;;  %v3725_v61 = vld [vmem:[%s4300_s2 + $0xa0] sm:$0xff] }
  0x74   : > { %2529 = vmatmul.mubr.f32.gmra.mrb[34].mxu0 %v307_v2 }
  0x75   : > { %2531 = vmatprep.mubr.f32.mxu0 %v308_v6  ;;  %v3109_v6 = vpack.c.bf16 %v1262_v1, %v1259_v0  ;;  %3108 = vmatpush1.bf16.msra.mxu0 %v3107_v3  ;;  %v3741_v1 = vld [vmem:[%s4300_s2 + $0xb0] sm:$0xff]  ;;  %v3751_v3 = vld [vmem:[%s4300_s2 + $0xb8] sm:$0xff] }
  0x77   : > { %3110 = vmatprep.subr.bf16.mxu0 %v3109_v6  ;;  %v3757_v6 = vld [vmem:[%s4300_s2 + $0xc0] sm:$0xff] }
  0x78   : > { %2532 = vmatmul.mubr.f32.gmra.mrb[36].mxu0 %v309_v11  ;;  %v1265_v11 = vld [vmem:[%s4303_s5 + $0x98] sm:$0xff] }
  0x79   : > { %2534 = vmatprep.mubr.f32.mxu0 %v310_v15  ;;  %v3113_v16 = vpack.c.bf16 %v1268_v12, %v1265_v11  ;;  %3112 = vmatpush1.bf16.msra.mxu0 %v3111_v14  ;;  %v3771_v11 = vld [vmem:[%s4300_s2 + $0xd0] sm:$0xff] }
  0x7b   : > { %3114 = vmatprep.subr.bf16.mxu0 %v3113_v16 }
  0x7c   : > { %2535 = vmatmul.mubr.f32.gmra.mrb[38].mxu0 %v311_v17  ;;  %v1264_v17 = vld [vmem:[%s4303_s5 + $0x90] sm:$0xff] }
  0x7d   : > { %2537 = vmatprep.mubr.f32.mxu0 %v312_v18  ;;  %v1267_v18 = vld [vmem:[%s4303_s5 + $0xa8] sm:$0xff] }
  0x80   : > { %2538 = vmatmul.mubr.f32.gmra.mrb[40].mxu0 %v313_v19  ;;  %v1271_v19 = vld [vmem:[%s4303_s5 + $0xc8] sm:$0xff] }
  0x81   : > { %2540 = vmatprep.mubr.f32.mxu0 %v314_v20  ;;  %v1274_v20 = vld [vmem:[%s4303_s5 + $0xe0] sm:$0xff] }
  0x84   : > { %2541 = vmatmul.mubr.f32.gmra.mrb[42].mxu0 %v315_v21 }
  0x85   : > { %2543 = vmatprep.mubr.f32.mxu0 %v316_v22  ;;  %v3115_v22 = vpack.c.bf16 %v1267_v18, %v1264_v17 }
  0x87   : > { %3116 = vmatpush1.bf16.msra.mxu0 %v3115_v22  ;;  %v3807_v22 = vld [vmem:[%s4300_s2 + $0xf8] sm:$0xff] }
  0x88   : > { %2544 = vmatmul.mubr.f32.gmra.mrb[44].mxu0 %v317_v23 }
  0x89   : > { %2546 = vmatprep.mubr.f32.mxu0 %v318_v24 }
  0x8c   : > { %2547 = vmatmul.mubr.f32.gmra.mrb[46].mxu0 %v319_v25  ;;  %v3117_v25 = vpack.c.bf16 %v1274_v20, %v1271_v19  ;;  %v3799_v19 = vld [vmem:[%s4300_s2 + $0xf0] sm:$0xff] }
  0x8d   : > { %1358 = vmatprep.mubr.f32.mxu0 %v4306_v7  ;;  %v1263_v7 = vld [vmem:[%s4303_s5 + $0x88] sm:$0xff] }
  0x8e   : > { %3118 = vmatprep.subr.bf16.mxu0 %v3117_v25 }
 0x103   : > { %v434_v27 = vpop.f32.mrb[0].mxu0 }
 0x104   : > { %v436_v28 = vpop.f32.mrb[1].mxu0 }
 0x107   : > { %v440_v29 = vpop.f32.mrb[2].mxu0 }
 0x108   : > { %v3612_v30 = vpack.c.bf16 %v440_v29, %v434_v27  ;;  %v442_v31 = vpop.f32.mrb[3].mxu0  ;;  %v1270_v27 = vld [vmem:[%s4303_s5 + $0xc0] sm:$0xff] }
 0x109   : > { %v3005_v32 = vpack.c.bf16 %v442_v31, %v436_v28  ;;  %v1273_v28 = vld [vmem:[%s4303_s5 + $0xd8] sm:$0xff] }
 0x10a   : > { %v1277_v31 = vld [vmem:[%s4303_s5 + $0xf8] sm:$0xff] }
 0x10b   : > { %v446_v33 = vpop.f32.mrb[4].mxu0  ;;  %3006 = vmatprep.subr.bf16.mxu1 %v3005_v32 }
 0x10c   : > { %v448_v34 = vpop.f32.mrb[5].mxu0  ;;  %3008 = vmatpush3.bf16.msra.mxu1 %v3005_v32  ;;  %v1280_v32 = vld [vmem:[%s4303_s5 + $0x110] sm:$0xff] }
 0x10f   : > { %v452_v35 = vpop.f32.mrb[6].mxu0 }
 0x110   : > { %v3614_v36 = vpack.c.bf16 %v452_v35, %v446_v33  ;;  %v454_v37 = vpop.f32.mrb[7].mxu0 }
 0x111   : > { %v3009_v38 = vpack.c.bf16 %v454_v37, %v448_v34  ;;  %v3119_v34 = vpack.c.bf16 %v1273_v28, %v1270_v27  ;;  %v3121_v37 = vpack.c.bf16 %v1280_v32, %v1277_v31  ;;  %v3821_v27 = vld [vmem:[%s4300_s2 + $0x8] sm:$0xff]  ;;  %v3827_v28 = vld [vmem:[%s4300_s2 + $0x10] sm:$0xff]  ;;  %v3841_v31 = vld [vmem:[%s4300_s2 + $0x20] sm:$0xff] }
 0x112   : > { %v3849_v32 = vld [vmem:[%s4300_s2 + $0x28] sm:$0xff] }
 0x113   : > { %v458_v39 = vpop.f32.mrb[8].mxu0  ;;  %3010 = vmatprep.subr.bf16.mxu1 %v3009_v38  ;;  %3120 = vmatpush1.bf16.msra.mxu0 %v3119_v34  ;;  %v3863_v34 = vld [vmem:[%s4300_s2 + $0x38] sm:$0xff] }
 0x114   : > { %v460_v40 = vpop.f32.mrb[9].mxu0  ;;  %3012 = vmatpush3.bf16.msra.mxu1 %v3009_v38  ;;  %v1276_v38 = vld [vmem:[%s4303_s5 + $0xf0] sm:$0xff]  ;;  %3122 = vmatprep.subr.bf16.mxu0 %v3121_v37  ;;  %v3875_v37 = vld [vmem:[%s4300_s2 + $0x48] sm:$0xff] }
 0x117   : > { %v464_v41 = vpop.f32.mrb[10].mxu0 }
 0x118   : > { %v3616_v42 = vpack.c.bf16 %v464_v41, %v458_v39  ;;  %v466_v43 = vpop.f32.mrb[11].mxu0  ;;  %v1279_v39 = vld [vmem:[%s4303_s5 + $0x108] sm:$0xff] }
 0x119   : > { %v3013_v44 = vpack.c.bf16 %v466_v43, %v460_v40  ;;  %v3123_v41 = vpack.c.bf16 %v1279_v39, %v1276_v38  ;;  %v3880_v38 = vld [vmem:[%s4300_s2 + $0x50] sm:$0xff]  ;;  %v3887_v39 = vld [vmem:[%s4300_s2 + $0x58] sm:$0xff] }
 0x11b   : > { %v470_v45 = vpop.f32.mrb[12].mxu0  ;;  %3014 = vmatprep.subr.bf16.mxu1 %v3013_v44  ;;  %3124 = vmatpush1.bf16.msra.mxu0 %v3123_v41  ;;  %v3899_v41 = vld [vmem:[%s4300_s2 + $0x68] sm:$0xff] }
 0x11c   : > { %v472_v46 = vpop.f32.mrb[13].mxu0  ;;  %3016 = vmatpush3.bf16.msra.mxu1 %v3013_v44 }
 0x11f   : > { %v476_v47 = vpop.f32.mrb[14].mxu0 }
 0x120   : > { %v3618_v48 = vpack.c.bf16 %v476_v47, %v470_v45  ;;  %v478_v49 = vpop.f32.mrb[15].mxu0 }
 0x121   : > { %v3017_v50 = vpack.c.bf16 %v478_v49, %v472_v46 }
 0x123   : > { %v482_v51 = vpop.f32.mrb[16].mxu0  ;;  %3018 = vmatprep.subr.bf16.mxu1 %v3017_v50 }
 0x124   : > { %v484_v55 = vpop.f32.mrb[17].mxu0  ;;  %3020 = vmatpush3.bf16.msra.mxu1 %v3017_v50 }
 0x127   : > { %v488_v2 = vpop.f32.mrb[18].mxu0 }
 0x128   : > { %v3650_v4 = vpack.c.bf16 %v488_v2, %v482_v51  ;;  %v490_v5 = vpop.f32.mrb[19].mxu0 }
 0x129   : > { %v3021_v10 = vpack.c.bf16 %v490_v5, %v484_v55 }
 0x12b   : > { %v494_v13 = vpop.f32.mrb[20].mxu0  ;;  %3022 = vmatprep.subr.bf16.mxu1 %v3021_v10 }
 0x12c   : > { %v496_v15 = vpop.f32.mrb[21].mxu0  ;;  %3024 = vmatpush3.bf16.msra.mxu1 %v3021_v10 }
 0x12f   : > { %v500_v21 = vpop.f32.mrb[22].mxu0 }
 0x130   : > { %v3676_v23 = vpack.c.bf16 %v500_v21, %v494_v13  ;;  %v502_v24 = vpop.f32.mrb[23].mxu0 }
 0x131   : > { %v3025_v29 = vpack.c.bf16 %v502_v24, %v496_v15  ;;  %v3785_v15 = vld [vmem:[%s4300_s2 + $0xe0] sm:$0xff] }
 0x132   : > { %v3813_v24 = vld [vmem:[%s4300_s2] sm:$0xff] }
 0x133   : > { %v506_v33 = vpop.f32.mrb[24].mxu0  ;;  %3026 = vmatprep.subr.bf16.mxu1 %v3025_v29 }
 0x134   : > { %v508_v35 = vpop.f32.mrb[25].mxu0  ;;  %3028 = vmatpush3.bf16.msra.mxu1 %v3025_v29  ;;  %v3835_v29 = vld [vmem:[%s4300_s2 + $0x18] sm:$0xff] }
 0x137   : > { %v512_v40 = vpop.f32.mrb[26].mxu0 }
 0x138   : > { %v3696_v43 = vpack.c.bf16 %v512_v40, %v506_v33  ;;  %v514_v44 = vpop.f32.mrb[27].mxu0  ;;  %v3855_v33 = vld [vmem:[%s4300_s2 + $0x30] sm:$0xff]  ;;  %v3892_v40 = vld [vmem:[%s4300_s2 + $0x60] sm:$0xff] }
 0x139   : > { %v3029_v45 = vpack.c.bf16 %v514_v44, %v508_v35  ;;  %v3868_v35 = vld [vmem:[%s4300_s2 + $0x40] sm:$0xff]  ;;  %v3911_v44 = vld [vmem:[%s4300_s2 + $0x78] sm:$0xff] }
 0x13b   : > { %v518_v46 = vpop.f32.mrb[28].mxu0  ;;  %3030 = vmatprep.subr.bf16.mxu1 %v3029_v45 }
 0x13c   : > { %v520_v47 = vpop.f32.mrb[29].mxu0  ;;  %3032 = vmatpush3.bf16.msra.mxu1 %v3029_v45  ;;  %v3916_v45 = vld [vmem:[%s4300_s2 + $0x100] sm:$0xff] }
 0x13f   : > { %v524_v49 = vpop.f32.mrb[30].mxu0 }
 0x140   : > { %v3698_v50 = vpack.c.bf16 %v524_v49, %v518_v46  ;;  %v526_v51 = vpop.f32.mrb[31].mxu0  ;;  %v3923_v46 = vld [vmem:[%s4300_s2 + $0x108] sm:$0xff]  ;;  %v3935_v49 = vld [vmem:[%s4300_s2 + $0x118] sm:$0xff] }
 0x141   : > { %v3033_v52 = vpack.c.bf16 %v526_v51, %v520_v47  ;;  %v3928_v47 = vld [vmem:[%s4300_s2 + $0x110] sm:$0xff]  ;;  %4323 = vst [vmem:[#allocation3_spill] sm:$0xff] %v3935_v49  ;;  %v3947_v51 = vld [vmem:[%s4300_s2 + $0x128] sm:$0xff] }
 0x142   : > { %4322 = vst [vmem:[#allocation2_spill] sm:$0xff] %v3928_v47  ;;  %4325 = vst [vmem:[#allocation5_spill] sm:$0xff] %v3947_v51 }
 0x143   : > { %3034 = vmatprep.subr.bf16.mxu1 %v3033_v52  ;;  %v2527_v53 = vpop.f32.mrb[32].mxu0 }
 0x144   : > { %3036 = vmatpush3.bf16.msra.mxu1 %v3033_v52  ;;  %v595_v55 = vpop.f32.mrb[33].mxu0  ;;  %v3952_v52 = vld [vmem:[%s4300_s2 + $0x130] sm:$0xff] }
 0x145   : > { %3038 = vmatprep.subr.bf16.mxu1 %v3612_v30  ;;  %v3711_v57 = vpack.c.bf16 %v2527_v53, %v595_v55  ;;  %4326 = vst [vmem:[#allocation6_spill] sm:$0xff] %v3952_v52  ;;  %v3959_v53 = vld [vmem:[%s4300_s2 + $0x138] sm:$0xff]  ;;  %v3964_v55 = vld [vmem:[%s4300_s2 + $0x140] sm:$0xff] }
 0x146   : > { %4327 = vst [vmem:[#allocation7_spill] sm:$0xff] %v3959_v53  ;;  %4328 = vst [vmem:[#allocation8_spill] sm:$0xff] %v3964_v55 }
 0x147   : > { %2582 = vmatmul.mubr.f32.vlgmr.msra.gmra.mrb[0].mxu1 %v3703_v54  ;;  %v2530_v58 = vpop.f32.mrb[34].mxu0 }
 0x148   : > { %3040 = vmatpush3.bf16.msra.mxu1 %v3612_v30  ;;  %2584 = vmatprep.mubr.f32.mxu1 %v3709_v56  ;;  %v605_v60 = vpop.f32.mrb[35].mxu0 }
 0x149   : > { %3042 = vmatprep.subr.bf16.mxu1 %v3614_v36  ;;  %v3727_v62 = vpack.c.bf16 %v2530_v58, %v605_v60  ;;  %v3976_v58 = vld [vmem:[%s4300_s2 + $0x150] sm:$0xff]  ;;  %v3983_v60 = vld [vmem:[%s4300_s2 + $0x158] sm:$0xff] }
 0x14a   : > { %4330 = vst [vmem:[#allocation10_spill] sm:$0xff] %v3976_v58  ;;  %4331 = vst [vmem:[#allocation11_spill] sm:$0xff] %v3983_v60 }
 0x14b   : > { %2585 = vmatmul.mubr.f32.gmra.mrb[2].mxu1 %v3719_v59  ;;  %v2533_v30 = vpop.f32.mrb[36].mxu0 }
 0x14c   : > { %3044 = vmatpush3.bf16.msra.mxu1 %v3614_v36  ;;  %2587 = vmatprep.mubr.f32.mxu1 %v3725_v61  ;;  %v615_v0 = vpop.f32.mrb[37].mxu0 }
 0x14d   : > { %3046 = vmatprep.subr.bf16.mxu1 %v3616_v42  ;;  %v3743_v2 = vpack.c.bf16 %v2533_v30, %v615_v0  ;;  %v3995_v30 = vld [vmem:[%s4300_s2 + $0x168] sm:$0xff]  ;;  %v4000_v0 = vld [vmem:[%s4300_s2 + $0x170] sm:$0xff] }
 0x14e   : > { %4333 = vst [vmem:[#allocation13_spill] sm:$0xff] %v3995_v30  ;;  %4334 = vst [vmem:[#allocation14_spill] sm:$0xff] %v4000_v0 }
 0x14f   : > { %2588 = vmatmul.mubr.f32.gmra.mrb[4].mxu1 %v3735_v63  ;;  %v2536_v36 = vpop.f32.mrb[38].mxu0 }
 0x150   : > { %3048 = vmatpush3.bf16.msra.mxu1 %v3616_v42  ;;  %2590 = vmatprep.mubr.f32.mxu1 %v3741_v1  ;;  %v625_v5 = vpop.f32.mrb[39].mxu0  ;;  %v3765_v42 = vld [vmem:[%s4300_s2 + $0xc8] sm:$0xff] }
 0x151   : > { %3050 = vmatprep.subr.bf16.mxu1 %v3618_v48  ;;  %v3081_v8 = vpack.c.bf16 %v2536_v36, %v625_v5  ;;  %v1283_v36 = vld [vmem:[%s4303_s5 + $0x128] sm:$0xff]  ;;  %v1286_v5 = vld [vmem:[%s4303_s5 + $0x140] sm:$0xff] }
 0x153   : > { %2591 = vmatmul.mubr.f32.gmra.mrb[6].mxu1 %v3751_v3  ;;  %v2539_v9 = vpop.f32.mrb[40].mxu0 }
 0x154   : > { %3052 = vmatpush3.bf16.msra.mxu1 %v3618_v48  ;;  %2593 = vmatprep.mubr.f32.mxu1 %v3757_v6  ;;  %v635_v10 = vpop.f32.mrb[41].mxu0  ;;  %v3779_v48 = vld [vmem:[%s4300_s2 + $0xd8] sm:$0xff] }
 0x155   : > { %3054 = vmatprep.subr.bf16.mxu1 %v3650_v4  ;;  %v3085_v12 = vpack.c.bf16 %v2539_v9, %v635_v10  ;;  %v1282_v9 = vld [vmem:[%s4303_s5 + $0x120] sm:$0xff]  ;;  %v1285_v10 = vld [vmem:[%s4303_s5 + $0x138] sm:$0xff] }
 0x157   : > { %2594 = vmatmul.mubr.f32.gmra.mrb[8].mxu1 %v3765_v42  ;;  %v2542_v13 = vpop.f32.mrb[42].mxu0 }
 0x158   : > { %3056 = vmatpush3.bf16.msra.mxu1 %v3650_v4  ;;  %2596 = vmatprep.mubr.f32.mxu1 %v3771_v11  ;;  %v645_v14 = vpop.f32.mrb[43].mxu0  ;;  %v3793_v4 = vld [vmem:[%s4300_s2 + $0xe8] sm:$0xff] }
 0x159   : > { %3058 = vmatprep.subr.bf16.mxu1 %v3676_v23  ;;  %v3089_v16 = vpack.c.bf16 %v2542_v13, %v645_v14  ;;  %v1292_v13 = vld [vmem:[%s4303_s5 + $0x170] sm:$0xff] }
 0x15b   : > { %2597 = vmatmul.mubr.f32.gmra.mrb[10].mxu1 %v3779_v48  ;;  %v2545_v17 = vpop.f32.mrb[44].mxu0 }
 0x15c   : > { %3060 = vmatpush3.bf16.msra.mxu1 %v3676_v23  ;;  %2599 = vmatprep.mubr.f32.mxu1 %v3785_v15  ;;  %v655_v18 = vpop.f32.mrb[45].mxu0 }
 0x15d   : > { %3062 = vmatprep.subr.bf16.mxu1 %v3696_v43  ;;  %v3093_v20 = vpack.c.bf16 %v2545_v17, %v655_v18  ;;  %v1291_v17 = vld [vmem:[%s4303_s5 + $0x168] sm:$0xff] }
 0x15f   : > { %2600 = vmatmul.mubr.f32.gmra.mrb[12].mxu1 %v3793_v4  ;;  %v2548_v21 = vpop.f32.mrb[46].mxu0 }
 0x160   : > { %3064 = vmatpush3.bf16.msra.mxu1 %v3696_v43  ;;  %2602 = vmatprep.mubr.f32.mxu1 %v3799_v19  ;;  %v665_v23 = vpop.f32.mrb[47].mxu0  ;;  %v3904_v43 = vld [vmem:[%s4300_s2 + $0x70] sm:$0xff] }
 0x161   : > { %3066 = vmatprep.subr.bf16.mxu1 %v3698_v50  ;;  %v3097_v25 = vpack.c.bf16 %v2548_v21, %v665_v23  ;;  %v1251_v21 = vld [vmem:[%s4303_s5 + $0x28] sm:$0xff] }
 0x163   : > { %2603 = vmatmul.mubr.f32.gmra.mrb[14].mxu1 %v3807_v22 }
 0x164   : > { %3068 = vmatpush3.bf16.msra.mxu1 %v3698_v50  ;;  %2637 = vmatprep.mubr.f32.mxu1 %v3813_v24  ;;  %v3940_v50 = vld [vmem:[%s4300_s2 + $0x120] sm:$0xff] }
 0x165   : > { %3070 = vmatprep.subr.bf16.mxu1 %v3711_v57  ;;  %4324 = vst [vmem:[#allocation4_spill] sm:$0xff] %v3940_v50 }
 0x167   : > { %2638 = vmatmul.mubr.f32.vlgmr.msra.gmra.mrb[0].mxu1 %v3821_v27 }
 0x168   : > { %3072 = vmatpush3.bf16.msra.mxu1 %v3711_v57  ;;  %2640 = vmatprep.mubr.f32.mxu1 %v3827_v28  ;;  %v3971_v57 = vld [vmem:[%s4300_s2 + $0x148] sm:$0xff] }
 0x169   : > { %3074 = vmatprep.subr.bf16.mxu1 %v3727_v62  ;;  %4329 = vst [vmem:[#allocation9_spill] sm:$0xff] %v3971_v57 }
 0x16b   : > { %2641 = vmatmul.mubr.f32.gmra.mrb[2].mxu1 %v3835_v29 }
 0x16c   : > { %3076 = vmatpush3.bf16.msra.mxu1 %v3727_v62  ;;  %2643 = vmatprep.mubr.f32.mxu1 %v3841_v31  ;;  %v3988_v62 = vld [vmem:[%s4300_s2 + $0x160] sm:$0xff] }
 0x16d   : > { %3078 = vmatprep.subr.bf16.mxu1 %v3743_v2  ;;  %4332 = vst [vmem:[#allocation12_spill] sm:$0xff] %v3988_v62 }
 0x16f   : > { %2644 = vmatmul.mubr.f32.gmra.mrb[4].mxu1 %v3849_v32 }
 0x170   : > { %3080 = vmatpush3.bf16.msra.mxu1 %v3743_v2  ;;  %2646 = vmatprep.mubr.f32.mxu1 %v3855_v33  ;;  %v4007_v2 = vld [vmem:[%s4300_s2 + $0x178] sm:$0xff] }
 0x171   : > { %3082 = vmatprep.subr.bf16.mxu1 %v3081_v8  ;;  %4335 = vst [vmem:[#allocation15_spill] sm:$0xff] %v4007_v2 }
 0x173   : > { %2647 = vmatmul.mubr.f32.gmra.mrb[6].mxu1 %v3863_v34 }
 0x174   : > { %3084 = vmatpush3.bf16.msra.mxu1 %v3081_v8  ;;  %2649 = vmatprep.mubr.f32.mxu1 %v3868_v35  ;;  %v3125_v8 = vpack.c.bf16 %v1286_v5, %v1283_v36 }
 0x175   : > { %3086 = vmatprep.subr.bf16.mxu1 %v3085_v12 }
 0x176   : > { %3126 = vmatprep.subr.bf16.mxu0 %v3125_v8 }
 0x177   : > { %2650 = vmatmul.mubr.f32.gmra.mrb[8].mxu1 %v3875_v37 }
 0x178   : > { %3088 = vmatpush3.bf16.msra.mxu1 %v3085_v12  ;;  %2652 = vmatprep.mubr.f32.mxu1 %v3880_v38  ;;  %v3127_v12 = vpack.c.bf16 %v1285_v10, %v1282_v9  ;;  %v1214_v10 = vld [vmem:[%s4050_s8] sm:$0xff] }
 0x179   : > { %3090 = vmatprep.subr.bf16.mxu1 %v3089_v16 }
 0x17a   : > { %3128 = vmatpush1.bf16.msra.mxu0 %v3127_v12  ;;  %v1254_v12 = vld [vmem:[%s4303_s5 + $0x40] sm:$0xff] }
 0x17b   : > { %2653 = vmatmul.mubr.f32.gmra.mrb[10].mxu1 %v3887_v39 }
 0x17c   : > { %3092 = vmatpush3.bf16.msra.mxu1 %v3089_v16  ;;  %2655 = vmatprep.mubr.f32.mxu1 %v3892_v40  ;;  %v1288_v16 = vld [vmem:[%s4303_s5 + $0x150] sm:$0xff] }
 0x17d   : > { %3094 = vmatprep.subr.bf16.mxu1 %v3093_v20  ;;  %v3131_v18 = vpack.c.bf16 %v1291_v17, %v1288_v16 }
 0x17f   : > { %2656 = vmatmul.mubr.f32.gmra.mrb[12].mxu1 %v3899_v41 }
 0x180   : > { %3096 = vmatpush3.bf16.msra.mxu1 %v3093_v20  ;;  %2658 = vmatprep.mubr.f32.mxu1 %v3904_v43  ;;  %v1248_v20 = vld [vmem:[%s4303_s5 + $0x10] sm:$0xff] }
 0x181   : > { %3098 = vmatprep.subr.bf16.mxu1 %v3097_v25  ;;  %v3133_v23 = vpack.c.bf16 %v1251_v21, %v1248_v20 }
 0x183   : > { %2659 = vmatmul.mubr.f32.gmra.mrb[14].mxu1 %v3911_v44 }
 0x184   : > { %3100 = vmatpush3.bf16.msra.mxu1 %v3097_v25  ;;  %2693 = vmatprep.mubr.f32.mxu1 %v3916_v45  ;;  %v4044_v25 = vld [vmem:[%s4302_s4] ss:$0 sm:$0xff] }
 0x187   : > { %2694 = vmatmul.mubr.f32.vlgmr.msra.gmra.mrb[0].mxu1 %v3923_v46 }
 0x188   : > { %2696 = vmatprep.mubr.f32.mxu1 %v3928_v47 }
 0x18b   : > { %2697 = vmatmul.mubr.f32.gmra.mrb[2].mxu1 %v3935_v49 }
 0x18c   : > { %2699 = vmatprep.mubr.f32.mxu1 %v3940_v50 }
 0x18f   : > { %2700 = vmatmul.mubr.f32.gmra.mrb[4].mxu1 %v3947_v51  ;;  %v1293_v51 = vld [vmem:[%s4303_s5 + $0x178] sm:$0xff] }
 0x190   : > { %2702 = vmatprep.mubr.f32.mxu1 %v3952_v52 }
 0x193   : > { %2703 = vmatmul.mubr.f32.gmra.mrb[6].mxu1 %v3959_v53  ;;  %v1287_v53 = vld [vmem:[%s4303_s5 + $0x148] sm:$0xff] }
 0x194   : > { %2705 = vmatprep.mubr.f32.mxu1 %v3964_v55 }
 0x197   : > { %2706 = vmatmul.mubr.f32.gmra.mrb[8].mxu1 %v3971_v57  ;;  %v1281_v57 = vld [vmem:[%s4303_s5 + $0x118] sm:$0xff] }
 0x198   : > { %2708 = vmatprep.mubr.f32.mxu1 %v3976_v58 }
 0x19b   : > { %2709 = vmatmul.mubr.f32.gmra.mrb[10].mxu1 %v3983_v60  ;;  %v1275_v60 = vld [vmem:[%s4303_s5 + $0xe8] sm:$0xff] }
 0x19c   : > { %2711 = vmatprep.mubr.f32.mxu1 %v3988_v62 }
 0x19f   : > { %2712 = vmatmul.mubr.f32.gmra.mrb[12].mxu1 %v3995_v30  ;;  %v1269_v30 = vld [vmem:[%s4303_s5 + $0xb8] sm:$0xff] }
 0x1a0   : > { %2714 = vmatprep.mubr.f32.mxu1 %v4000_v0  ;;  %v1266_v0 = vld [vmem:[%s4303_s5 + $0xa0] sm:$0xff] }
 0x1a3   : > { %2715 = vmatmul.mubr.f32.gmra.mrb[14].mxu1 %v4007_v2 }
 0x1a4   : > { %2805 = vmatprep.mubr.f32.mxu1 %v3609_v26  ;;  %v1289_v26 = vld [vmem:[%s4303_s5 + $0x158] sm:$0xff] }
 0x1a5   : > { %v3129_v14 = vpack.c.bf16 %v1292_v13, %v1289_v26  ;;  %v1257_v26 = vld [vmem:[%s4303_s5 + $0x58] sm:$0xff] }
 0x1a6   : > { %v3137_v21 = vpack.c.bf16 %v1257_v26, %v1254_v12 }
 0x1a7   : > { %3130 = vmatprep.subr.bf16.mxu0 %v3129_v14 }
 0x1a8   : > { %3132 = vmatpush1.bf16.msra.mxu0 %v3131_v18 }
 0x1a9   : > { %3134 = vmatprep.subr.bf16.mxu0 %v3133_v23 }
 0x25a   : > { %v2695_v36 = vpop.f32.mrb[0].mxu1 }
 0x25b   : > { %v1080_v5 = vpop.f32.mrb[1].mxu1  ;;  %v1183_v8 = vadd.f32 %v2695_v36, %v4044_v25  ;;  %v1215_v36 = vld [vmem:[%s4050_s8 + $0x8] sm:$0xff] }
 0x25c   : > { %v1182_v9 = vadd.f32 %v4044_v25, %v1080_v5  ;;  %v1260_v5 = vld [vmem:[%s4303_s5 + $0x70] sm:$0xff] }
 0x25d   : > { %v1199_v17 = vmax.f32 %v1183_v8, 0.0  ;;  %v4336_v8 = vmov 0.0  }
 0x25e   : > { %v1198_v13 = vmax.f32 %v1182_v9, 0.0  ;;  %v2698_v14 = vpop.f32.mrb[2].mxu1 }
 0x25f   : > { %v1090_v16 = vpop.f32.mrb[3].mxu1  ;;  %v1185_v12 = vadd.f32 %v2698_v14, %v4044_v25 }
 0x260   : > { %v4061_v18 = vadd.f32 %v1214_v10, %v1198_v13  ;;  %v1184_v20 = vadd.f32 %v4044_v25, %v1090_v16  ;;  %v4073_v10 = vadd.f32 %v1215_v36, %v1199_v17  ;;  %v3141_v13 = vpack.c.bf16 %v1263_v7, %v1260_v5  ;;  %v1216_v16 = vld [vmem:[%s4050_s8 + $0x10] sm:$0xff]  ;;  %v1217_v36 = vld [vmem:[%s4050_s8 + $0x18] sm:$0xff] }
 0x261   : > { %v1201_v14 = vmax.f32 %v1185_v12, 0.0  ;;  %v1272_v5 = vld [vmem:[%s4303_s5 + $0xd0] sm:$0xff] }
 0x262   : > { %v2701_v2 = vpop.f32.mrb[4].mxu1  ;;  %1359 = vmatmul.mubr.f32.vlgmr.msra.gmra.mrb[48].mxu0 %v4061_v18  ;;  %v1200_v26 = vmax.f32 %v1184_v20, 0.0  ;;  %v3145_v20 = vpack.c.bf16 %v1269_v30, %v1266_v0  ;;  %v3149_v12 = vpack.c.bf16 %v1275_v60, %v1272_v5  ;;  %v1284_v5 = vld [vmem:[%s4303_s5 + $0x130] sm:$0xff] }
 0x263   : > { %v1100_v9 = vpop.f32.mrb[5].mxu1  ;;  %1364 = vmatprep.mubr.f32.mxu0 %v4336_v8  ;;  %3136 = vmatpush3.bf16.msra.mxu0 %v3133_v23  ;;  %v1187_v30 = vadd.f32 %v2701_v2, %v4044_v25 }
 0x264   : > { %3138 = vmatprep.subr.bf16.mxu0 %v3137_v21  ;;  %v4085_v17 = vadd.f32 %v1216_v16, %v1200_v26  ;;  %v1186_v7 = vadd.f32 %v4044_v25, %v1100_v9  ;;  %v4097_v9 = vadd.f32 %v1217_v36, %v1201_v14  ;;  %v1218_v26 = vld [vmem:[%s4050_s8 + $0x20] sm:$0xff]  ;;  %v1219_v36 = vld [vmem:[%s4050_s8 + $0x28] sm:$0xff] }
 0x265   : > { %v1278_v16 = vld [vmem:[%s4303_s5 + $0x100] sm:$0xff]  ;;  %v1203_v2 = vmax.f32 %v1187_v30, 0.0 }
 0x266   : > { %v2704_v62 = vpop.f32.mrb[6].mxu1  ;;  %1365 = vmatmul.mubr.f32.gmra.mrb[50].mxu0 %v4073_v10  ;;  %v1202_v0 = vmax.f32 %v1186_v7, 0.0  ;;  %v3153_v7 = vpack.c.bf16 %v1281_v57, %v1278_v16  ;;  %v1290_v16 = vld [vmem:[%s4303_s5 + $0x160] sm:$0xff] }
 0x267   : > { %v1110_v23 = vpop.f32.mrb[7].mxu1  ;;  %1370 = vmatprep.mubr.f32.mxu0 %v4336_v8  ;;  %3140 = vmatpush3.bf16.msra.mxu0 %v3137_v21  ;;  %v1189_v57 = vadd.f32 %v2704_v62, %v4044_v25 }
 0x268   : > { %3142 = vmatprep.subr.bf16.mxu0 %v3141_v13  ;;  %v4109_v14 = vadd.f32 %v1218_v26, %v1202_v0  ;;  %v1188_v60 = vadd.f32 %v4044_v25, %v1110_v23  ;;  %v4121_v23 = vadd.f32 %v1219_v36, %v1203_v2  ;;  %v3157_v0 = vpack.c.bf16 %v1287_v53, %v1284_v5  ;;  %v1220_v26 = vld [vmem:[%s4050_s8 + $0x30] sm:$0xff]  ;;  %v1221_v36 = vld [vmem:[%s4050_s8 + $0x38] sm:$0xff] }
 0x269   : > { %v1205_v62 = vmax.f32 %v1189_v57, 0.0 }
 0x26a   : > { %v2707_v58 = vpop.f32.mrb[8].mxu1  ;;  %1371 = vmatmul.mubr.f32.gmra.mrb[52].mxu0 %v4085_v17  ;;  %v1204_v30 = vmax.f32 %v1188_v60, 0.0  ;;  %v3161_v60 = vpack.c.bf16 %v1293_v51, %v1290_v16  ;;  %v1224_v16 = vld [vmem:[%s4050_s8 + $0x50] sm:$0xff] }
 0x26b   : > { %v1120_v21 = vpop.f32.mrb[9].mxu1  ;;  %1376 = vmatprep.mubr.f32.mxu0 %v4336_v8  ;;  %3144 = vmatpush3.bf16.msra.mxu0 %v3141_v13  ;;  %v1237_v5 = vadd.f32 %v1221_v36, %v1205_v62  ;;  %v1191_v49 = vadd.f32 %v2707_v58, %v4044_v25 }
 0x26c   : > { %3146 = vmatprep.subr.bf16.mxu0 %v3145_v20  ;;  %v4133_v2 = vadd.f32 %v1220_v26, %v1204_v30  ;;  %v1190_v53 = vadd.f32 %v4044_v25, %v1120_v21  ;;  %v1223_v30 = vld [vmem:[%s4050_s8 + $0x48] sm:$0xff] }
 0x26d   : > { %v1207_v51 = vmax.f32 %v1191_v49, 0.0  ;;  %v1225_v49 = vld [vmem:[%s4050_s8 + $0x58] sm:$0xff] }
 0x26e   : > { %v2710_v55 = vpop.f32.mrb[10].mxu1  ;;  %1377 = vmatmul.mubr.f32.gmra.mrb[54].mxu0 %v4097_v9  ;;  %v1206_v47 = vmax.f32 %v1190_v53, 0.0 }
 0x26f   : > { %v1130_v13 = vpop.f32.mrb[11].mxu1  ;;  %1382 = vmatprep.mubr.f32.mxu0 %v4336_v8  ;;  %3148 = vmatpush3.bf16.msra.mxu0 %v3145_v20  ;;  %v1193_v58 = vadd.f32 %v2710_v55, %v4044_v25  ;;  %v1226_v55 = vld [vmem:[%s4050_s8 + $0x60] sm:$0xff] }
 0x270   : > { %3150 = vmatprep.subr.bf16.mxu0 %v3149_v12  ;;  %v1192_v57 = vadd.f32 %v4044_v25, %v1130_v13 }
 0x271   : > { %v1209_v62 = vmax.f32 %v1193_v58, 0.0 }
 0x272   : > { %v2713_v52 = vpop.f32.mrb[12].mxu1  ;;  %1383 = vmatmul.mubr.f32.gmra.mrb[56].mxu0 %v4109_v14  ;;  %v1208_v26 = vmax.f32 %v1192_v57, 0.0 }
 0x273   : > { %v1140_v20 = vpop.f32.mrb[13].mxu1  ;;  %1388 = vmatprep.mubr.f32.mxu0 %v4336_v8  ;;  %3152 = vmatpush3.bf16.msra.mxu0 %v3149_v12  ;;  %v1241_v13 = vadd.f32 %v1225_v49, %v1209_v62 }
 0x274   : > { %3154 = vmatprep.subr.bf16.mxu0 %v3153_v7  ;;  %v1240_v53 = vadd.f32 %v1224_v16, %v1208_v26  ;;  %v1228_v16 = vld [vmem:[%s4050_s8 + $0x70] sm:$0xff] }
 0x276   : > { %v2716_v50 = vpop.f32.mrb[14].mxu1  ;;  %1389 = vmatmul.mubr.f32.gmra.mrb[58].mxu0 %v4121_v23 }
 0x277   : > { %v1150_v12 = vpop.f32.mrb[15].mxu1  ;;  %1394 = vmatprep.mubr.f32.mxu0 %v4336_v8  ;;  %3156 = vmatpush3.bf16.msra.mxu0 %v3153_v7  ;;  %v1222_v7 = vld [vmem:[%s4050_s8 + $0x40] sm:$0xff]  ;;  %v1197_v58 = vadd.f32 %v2716_v50, %v4044_v25 }
 0x278   : > { %3158 = vmatprep.subr.bf16.mxu0 %v3157_v0  ;;  %v1238_v21 = vadd.f32 %v1222_v7, %v1206_v47  ;;  %v1194_v47 = vadd.f32 %v4044_v25, %v1140_v20  ;;  %v1196_v57 = vadd.f32 %v4044_v25, %v1150_v12 }
 0x27a   : > { %1395 = vmatmul.mubr.f32.gmra.mrb[60].mxu0 %v4133_v2  ;;  %v1210_v36 = vmax.f32 %v1194_v47, 0.0  ;;  %v1212_v26 = vmax.f32 %v1196_v57, 0.0  ;;  %v1229_v47 = vld [vmem:[%s4050_s8 + $0x78] sm:$0xff] }
 0x27b   : > { %1400 = vmatprep.mubr.f32.mxu0 %v4336_v8  ;;  %3160 = vmatpush3.bf16.msra.mxu0 %v3157_v0  ;;  %v1239_v0 = vadd.f32 %v1223_v30, %v1207_v51  ;;  %v1227_v30 = vld [vmem:[%s4050_s8 + $0x68] sm:$0xff] }
 0x27c   : > { %3162 = vmatprep.subr.bf16.mxu0 %v3161_v60  ;;  %v1242_v51 = vadd.f32 %v1226_v55, %v1210_v36  ;;  %v1244_v62 = vadd.f32 %v1228_v16, %v1212_v26 }
 0x27e   : > { %1401 = vmatmul.mubr.f32.gmra.mrb[62].mxu0 %v1237_v5 }
 0x27f   : > { %1406 = vmatprep.mubr.f32.mxu0 %v4336_v8  ;;  %3164 = vmatpush3.bf16.msra.mxu0 %v3161_v60  ;;  %v1195_v60 = vadd.f32 %v2713_v52, %v4044_v25  ;;  %v1213_v52 = vmax.f32 %v1197_v58, 0.0 }
 0x281   : > { %v1211_v7 = vmax.f32 %v1195_v60, 0.0  ;;  %v1245_v49 = vadd.f32 %v1229_v47, %v1213_v52 }
 0x282   : > { %1407 = vmatmul.mubr.f32.gmra.mrb[64].mxu0 %v1238_v21 }
 0x283   : > { %1412 = vmatprep.mubr.f32.mxu0 %v4336_v8  ;;  %v1243_v20 = vadd.f32 %v1227_v30, %v1211_v7 }
 0x286   : > { %1413 = vmatmul.mubr.f32.gmra.mrb[66].mxu0 %v1239_v0 }
 0x287   : > { %1418 = vmatprep.mubr.f32.mxu0 %v4336_v8 }
 0x28a   : > { %1419 = vmatmul.mubr.f32.gmra.mrb[68].mxu0 %v1240_v53 }
 0x28b   : > { %1424 = vmatprep.mubr.f32.mxu0 %v4336_v8 }
 0x28e   : > { %1425 = vmatmul.mubr.f32.gmra.mrb[70].mxu0 %v1241_v13 }
 0x28f   : > { %1430 = vmatprep.mubr.f32.mxu0 %v4336_v8 }
 0x292   : > { %1431 = vmatmul.mubr.f32.gmra.mrb[72].mxu0 %v1242_v51 }
 0x293   : > { %1436 = vmatprep.mubr.f32.mxu0 %v4336_v8 }
 0x296   : > { %1437 = vmatmul.mubr.f32.gmra.mrb[74].mxu0 %v1243_v20 }
 0x297   : > { %1442 = vmatprep.mubr.f32.mxu0 %v4336_v8 }
 0x29a   : > { %1443 = vmatmul.mubr.f32.gmra.mrb[76].mxu0 %v1244_v62 }
 0x29b   : > { %1448 = vmatprep.mubr.f32.mxu0 %v4336_v8 }
 0x29e   : > { %1449 = vmatmul.mubr.f32.gmra.mrb[78].mxu0 %v1245_v49 }
 0x29f   : > { %2749 = vmatprep.mubr.f32.mxu0 %v4061_v18 }
 0x2a2   : > { %2750 = vmatmul.mubr.f32.vlgmr.msra.gmra.mrb[80].mxu0 %v4073_v10 }
 0x2a3   : > { %2752 = vmatprep.mubr.f32.mxu0 %v4085_v17 }
 0x2a6   : > { %2753 = vmatmul.mubr.f32.gmra.mrb[82].mxu0 %v4097_v9 }
 0x2a7   : > { %2755 = vmatprep.mubr.f32.mxu0 %v4109_v14 }
 0x2aa   : > { %2756 = vmatmul.mubr.f32.gmra.mrb[84].mxu0 %v4121_v23 }
 0x2ab   : > { %2758 = vmatprep.mubr.f32.mxu0 %v4133_v2 }
 0x2ae   : > { %2759 = vmatmul.mubr.f32.gmra.mrb[86].mxu0 %v1237_v5 }
 0x2af   : > { %2761 = vmatprep.mubr.f32.mxu0 %v1238_v21 }
 0x2b2   : > { %2762 = vmatmul.mubr.f32.gmra.mrb[88].mxu0 %v1239_v0 }
 0x2b3   : > { %2764 = vmatprep.mubr.f32.mxu0 %v1240_v53 }
 0x2b6   : > { %2765 = vmatmul.mubr.f32.gmra.mrb[90].mxu0 %v1241_v13 }
 0x2b7   : > { %2767 = vmatprep.mubr.f32.mxu0 %v1242_v51 }
 0x2ba   : > { %2768 = vmatmul.mubr.f32.gmra.mrb[92].mxu0 %v1243_v20 }
 0x2bb   : > { %2770 = vmatprep.mubr.f32.mxu0 %v1244_v62 }
 0x2be   : > { %2771 = vmatmul.mubr.f32.gmra.mrb[94].mxu0 %v1245_v49 }
 0x335   : > { %v1360_v50 = vpop.f32.mrb[48].mxu0 }
 0x336   : > { %v1362_v25 = vpop.f32.mrb[49].mxu0 }
 0x339   : > { %v1366_v18 = vpop.f32.mrb[50].mxu0 }
 0x33a   : > { %v4169_v8 = vpack.c.bf16 %v1366_v18, %v1360_v50  ;;  %v1368_v10 = vpop.f32.mrb[51].mxu0 }
 0x33b   : > { %v3165_v17 = vpack.c.bf16 %v1368_v10, %v1362_v25 }
 0x33d   : > { %v1372_v9 = vpop.f32.mrb[52].mxu0  ;;  %3166 = vmatprep.subr.bf16.mxu1 %v3165_v17 }
 0x33e   : > { %v1374_v14 = vpop.f32.mrb[53].mxu0  ;;  %3168 = vmatpush3.bf16.msra.mxu1 %v3165_v17 }
 0x341   : > { %v1378_v23 = vpop.f32.mrb[54].mxu0 }
 0x342   : > { %v4171_v12 = vpack.c.bf16 %v1378_v23, %v1372_v9  ;;  %v1380_v2 = vpop.f32.mrb[55].mxu0 }
 0x343   : > { %v3169_v5 = vpack.c.bf16 %v1380_v2, %v1374_v14 }
 0x345   : > { %v1384_v21 = vpop.f32.mrb[56].mxu0  ;;  %3170 = vmatprep.subr.bf16.mxu1 %v3169_v5 }
 0x346   : > { %v1386_v0 = vpop.f32.mrb[57].mxu0  ;;  %3172 = vmatpush3.bf16.msra.mxu1 %v3169_v5 }
 0x349   : > { %v1390_v53 = vpop.f32.mrb[58].mxu0 }
 0x34a   : > { %v4173_v13 = vpack.c.bf16 %v1390_v53, %v1384_v21  ;;  %v1392_v60 = vpop.f32.mrb[59].mxu0 }
 0x34b   : > { %v3173_v36 = vpack.c.bf16 %v1392_v60, %v1386_v0 }
 0x34d   : > { %v1396_v55 = vpop.f32.mrb[60].mxu0  ;;  %3174 = vmatprep.subr.bf16.mxu1 %v3173_v36 }
 0x34e   : > { %v1398_v7 = vpop.f32.mrb[61].mxu0  ;;  %3176 = vmatpush3.bf16.msra.mxu1 %v3173_v36 }
 0x351   : > { %v1402_v51 = vpop.f32.mrb[62].mxu0 }
 0x352   : > { %v4175_v57 = vpack.c.bf16 %v1402_v51, %v1396_v55  ;;  %v1404_v30 = vpop.f32.mrb[63].mxu0 }
 0x353   : > { %v3177_v20 = vpack.c.bf16 %v1404_v30, %v1398_v7 }
 0x355   : > { %v1408_v58 = vpop.f32.mrb[64].mxu0  ;;  %3178 = vmatprep.subr.bf16.mxu1 %v3177_v20 }
 0x356   : > { %v1410_v26 = vpop.f32.mrb[65].mxu0  ;;  %3180 = vmatpush3.bf16.msra.mxu1 %v3177_v20 }
 0x359   : > { %v1414_v16 = vpop.f32.mrb[66].mxu0 }
 0x35a   : > { %v4177_v52 = vpack.c.bf16 %v1414_v16, %v1408_v58  ;;  %v1416_v62 = vpop.f32.mrb[67].mxu0 }
 0x35b   : > { %v3181_v47 = vpack.c.bf16 %v1416_v62, %v1410_v26 }
 0x35d   : > { %v1420_v49 = vpop.f32.mrb[68].mxu0  ;;  %3182 = vmatprep.subr.bf16.mxu1 %v3181_v47 }
 0x35e   : > { %v1422_v50 = vpop.f32.mrb[69].mxu0  ;;  %3184 = vmatpush3.bf16.msra.mxu1 %v3181_v47 }
 0x361   : > { %v1426_v25 = vpop.f32.mrb[70].mxu0 }
 0x362   : > { %v3217_v18 = vpack.c.bf16 %v1426_v25, %v1420_v49  ;;  %v1428_v10 = vpop.f32.mrb[71].mxu0 }
 0x363   : > { %v3185_v17 = vpack.c.bf16 %v1428_v10, %v1422_v50  ;;  %v3335_v10 = vld [vmem:[%s3518_s12] sm:$0xff] }
 0x365   : > { %v1432_v9 = vpop.f32.mrb[72].mxu0  ;;  %3186 = vmatprep.subr.bf16.mxu1 %v3185_v17 }
 0x366   : > { %v1434_v14 = vpop.f32.mrb[73].mxu0  ;;  %3188 = vmatpush3.bf16.msra.mxu1 %v3185_v17 }
 0x369   : > { %v1438_v23 = vpop.f32.mrb[74].mxu0 }
 0x36a   : > { %v3221_v2 = vpack.c.bf16 %v1438_v23, %v1432_v9  ;;  %v1440_v5 = vpop.f32.mrb[75].mxu0 }
 0x36b   : > { %v3189_v21 = vpack.c.bf16 %v1440_v5, %v1434_v14  ;;  %v3336_v5 = vld [vmem:[%s3518_s12 + $0x18] sm:$0xff] }
 0x36d   : > { %v1444_v0 = vpop.f32.mrb[76].mxu0  ;;  %3190 = vmatprep.subr.bf16.mxu1 %v3189_v21 }
 0x36e   : > { %v1446_v53 = vpop.f32.mrb[77].mxu0  ;;  %3192 = vmatpush3.bf16.msra.mxu1 %v3189_v21 }
 0x371   : > { %v1450_v60 = vpop.f32.mrb[78].mxu0 }
 0x372   : > { %v3225_v36 = vpack.c.bf16 %v1450_v60, %v1444_v0  ;;  %v1452_v55 = vpop.f32.mrb[79].mxu0  ;;  %v3337_v60 = vld [vmem:[%s3518_s12 + $0x10] sm:$0xff] }
 0x373   : > { %v3193_v7 = vpack.c.bf16 %v1452_v55, %v1446_v53 }
 0x375   : > { %v2751_v51 = vpop.f32.mrb[80].mxu0  ;;  %3194 = vmatprep.subr.bf16.mxu1 %v3193_v7 }
 0x376   : > { %v1521_v30 = vpop.f32.mrb[81].mxu0  ;;  %3196 = vmatpush3.bf16.msra.mxu1 %v3193_v7 }
 0x377   : > { %v3229_v20 = vpack.c.bf16 %v2751_v51, %v1521_v30  ;;  %3198 = vmatprep.subr.bf16.mxu1 %v4169_v8 }
 0x379   : > { %v2754_v58 = vpop.f32.mrb[82].mxu0  ;;  %2806 = vmatmul.mubr.f32.vlgmr.msra.gmra.mrb[16].mxu1 %v3703_v54 }
 0x37a   : > { %v1531_v26 = vpop.f32.mrb[83].mxu0  ;;  %3200 = vmatpush3.bf16.msra.mxu1 %v4169_v8  ;;  %2808 = vmatprep.mubr.f32.mxu1 %v3709_v56 }
 0x37b   : > { %v3233_v16 = vpack.c.bf16 %v2754_v58, %v1531_v26  ;;  %3202 = vmatprep.subr.bf16.mxu1 %v4171_v12 }
 0x37d   : > { %v2757_v62 = vpop.f32.mrb[84].mxu0  ;;  %2809 = vmatmul.mubr.f32.gmra.mrb[18].mxu1 %v3719_v59 }
 0x37e   : > { %v1541_v47 = vpop.f32.mrb[85].mxu0  ;;  %3204 = vmatpush3.bf16.msra.mxu1 %v4171_v12  ;;  %2811 = vmatprep.mubr.f32.mxu1 %v3725_v61 }
 0x37f   : > { %v3237_v49 = vpack.c.bf16 %v2757_v62, %v1541_v47  ;;  %3206 = vmatprep.subr.bf16.mxu1 %v4173_v13  ;;  %v3339_v62 = vld [vmem:[%s3518_s12 + $0x20] sm:$0xff] }
 0x381   : > { %v2760_v54 = vpop.f32.mrb[86].mxu0  ;;  %2812 = vmatmul.mubr.f32.gmra.mrb[20].mxu1 %v3735_v63 }
 0x382   : > { %v1551_v8 = vpop.f32.mrb[87].mxu0  ;;  %3208 = vmatpush3.bf16.msra.mxu1 %v4173_v13  ;;  %2814 = vmatprep.mubr.f32.mxu1 %v3741_v1 }
 0x383   : > { %v3241_v56 = vpack.c.bf16 %v2760_v54, %v1551_v8  ;;  %3210 = vmatprep.subr.bf16.mxu1 %v4175_v57 }
 0x385   : > { %v2763_v59 = vpop.f32.mrb[88].mxu0  ;;  %2815 = vmatmul.mubr.f32.gmra.mrb[22].mxu1 %v3751_v3 }
 0x386   : > { %v1561_v12 = vpop.f32.mrb[89].mxu0  ;;  %3212 = vmatpush3.bf16.msra.mxu1 %v4175_v57  ;;  %2817 = vmatprep.mubr.f32.mxu1 %v3757_v6 }
 0x387   : > { %v3245_v61 = vpack.c.bf16 %v2763_v59, %v1561_v12  ;;  %3214 = vmatprep.subr.bf16.mxu1 %v4177_v52  ;;  %v3340_v59 = vld [vmem:[%s3518_s12 + $0x38] sm:$0xff] }
 0x389   : > { %v2766_v63 = vpop.f32.mrb[90].mxu0  ;;  %2818 = vmatmul.mubr.f32.gmra.mrb[24].mxu1 %v3765_v42 }
 0x38a   : > { %v1571_v13 = vpop.f32.mrb[91].mxu0  ;;  %3216 = vmatpush3.bf16.msra.mxu1 %v4177_v52  ;;  %2820 = vmatprep.mubr.f32.mxu1 %v3771_v11  ;;  %v4337_v11 = vld [vmem:[#allocation2_spill] sm:$0xff] }
 0x38b   : > { %v3249_v1 = vpack.c.bf16 %v2766_v63, %v1571_v13  ;;  %3218 = vmatprep.subr.bf16.mxu1 %v3217_v18  ;;  %v3341_v13 = vld [vmem:[%s3518_s12 + $0x30] sm:$0xff] }
 0x38d   : > { %v2769_v50 = vpop.f32.mrb[92].mxu0  ;;  %2821 = vmatmul.mubr.f32.gmra.mrb[26].mxu1 %v3779_v48  ;;  %v4338_v48 = vld [vmem:[#allocation3_spill] sm:$0xff] }
 0x38e   : > { %v1581_v3 = vpop.f32.mrb[93].mxu0  ;;  %3220 = vmatpush3.bf16.msra.mxu1 %v3217_v18  ;;  %2823 = vmatprep.mubr.f32.mxu1 %v3785_v15  ;;  %v4339_v15 = vld [vmem:[#allocation4_spill] sm:$0xff] }
 0x38f   : > { %v3253_v6 = vpack.c.bf16 %v2769_v50, %v1581_v3  ;;  %3222 = vmatprep.subr.bf16.mxu1 %v3221_v2 }
 0x391   : > { %v2772_v57 = vpop.f32.mrb[94].mxu0  ;;  %2824 = vmatmul.mubr.f32.gmra.mrb[28].mxu1 %v3793_v4  ;;  %v4340_v4 = vld [vmem:[#allocation5_spill] sm:$0xff] }
 0x392   : > { %v1591_v42 = vpop.f32.mrb[95].mxu0  ;;  %3224 = vmatpush3.bf16.msra.mxu1 %v3221_v2  ;;  %2826 = vmatprep.mubr.f32.mxu1 %v3799_v19  ;;  %v4341_v19 = vld [vmem:[#allocation6_spill] sm:$0xff] }
 0x393   : > { %v3257_v52 = vpack.c.bf16 %v2772_v57, %v1591_v42  ;;  %3226 = vmatprep.subr.bf16.mxu1 %v3225_v36  ;;  %v3342_v42 = vld [vmem:[%s3518_s12 + $0x48] sm:$0xff] }
 0x395   : > { %2827 = vmatmul.mubr.f32.gmra.mrb[30].mxu1 %v3807_v22  ;;  %v4342_v22 = vld [vmem:[#allocation7_spill] sm:$0xff] }
 0x396   : > { %3228 = vmatpush3.bf16.msra.mxu1 %v3225_v36  ;;  %2861 = vmatprep.mubr.f32.mxu1 %v3813_v24  ;;  %v4343_v24 = vld [vmem:[#allocation8_spill] sm:$0xff] }
 0x397   : > { %3230 = vmatprep.subr.bf16.mxu1 %v3229_v20 }
 0x399   : > { %2862 = vmatmul.mubr.f32.vlgmr.msra.gmra.mrb[16].mxu1 %v3821_v27  ;;  %v4344_v27 = vld [vmem:[#allocation9_spill] sm:$0xff] }
 0x39a   : > { %3232 = vmatpush3.bf16.msra.mxu1 %v3229_v20  ;;  %2864 = vmatprep.mubr.f32.mxu1 %v3827_v28  ;;  %v4345_v28 = vld [vmem:[#allocation10_spill] sm:$0xff]  ;;  %v3338_v20 = vld [vmem:[%s3518_s12 + $0x28] sm:$0xff] }
 0x39b   : > { %3234 = vmatprep.subr.bf16.mxu1 %v3233_v16 }
 0x39d   : > { %2865 = vmatmul.mubr.f32.gmra.mrb[18].mxu1 %v3835_v29  ;;  %v4346_v29 = vld [vmem:[#allocation11_spill] sm:$0xff] }
 0x39e   : > { %3236 = vmatpush3.bf16.msra.mxu1 %v3233_v16  ;;  %2867 = vmatprep.mubr.f32.mxu1 %v3841_v31  ;;  %v4347_v31 = vld [vmem:[#allocation12_spill] sm:$0xff] }
 0x39f   : > { %3238 = vmatprep.subr.bf16.mxu1 %v3237_v49 }
 0x3a1   : > { %2868 = vmatmul.mubr.f32.gmra.mrb[20].mxu1 %v3849_v32  ;;  %v4348_v32 = vld [vmem:[#allocation13_spill] sm:$0xff] }
 0x3a2   : > { %3240 = vmatpush3.bf16.msra.mxu1 %v3237_v49  ;;  %2870 = vmatprep.mubr.f32.mxu1 %v3855_v33  ;;  %v4349_v33 = vld [vmem:[#allocation14_spill] sm:$0xff] }
 0x3a3   : > { %3242 = vmatprep.subr.bf16.mxu1 %v3241_v56 }
 0x3a5   : > { %2871 = vmatmul.mubr.f32.gmra.mrb[22].mxu1 %v3863_v34  ;;  %v4350_v34 = vld [vmem:[#allocation15_spill] sm:$0xff] }
 0x3a6   : > { %3244 = vmatpush3.bf16.msra.mxu1 %v3241_v56  ;;  %2873 = vmatprep.mubr.f32.mxu1 %v3868_v35  ;;  %v4239_v35 = vld [vmem:[%s4304_s6] ss:$0 sm:$0xff] }
 0x3a7   : > { %3246 = vmatprep.subr.bf16.mxu1 %v3245_v61 }
 0x3a9   : > { %2874 = vmatmul.mubr.f32.gmra.mrb[24].mxu1 %v3875_v37 }
 0x3aa   : > { %3248 = vmatpush3.bf16.msra.mxu1 %v3245_v61  ;;  %2876 = vmatprep.mubr.f32.mxu1 %v3880_v38 }
 0x3ab   : > { %3250 = vmatprep.subr.bf16.mxu1 %v3249_v1 }
 0x3ad   : > { %2877 = vmatmul.mubr.f32.gmra.mrb[26].mxu1 %v3887_v39 }
 0x3ae   : > { %3252 = vmatpush3.bf16.msra.mxu1 %v3249_v1  ;;  %2879 = vmatprep.mubr.f32.mxu1 %v3892_v40 }
 0x3af   : > { %3254 = vmatprep.subr.bf16.mxu1 %v3253_v6 }
 0x3b1   : > { %2880 = vmatmul.mubr.f32.gmra.mrb[28].mxu1 %v3899_v41 }
 0x3b2   : > { %3256 = vmatpush3.bf16.msra.mxu1 %v3253_v6  ;;  %2882 = vmatprep.mubr.f32.mxu1 %v3904_v43 }
 0x3b3   : > { %3258 = vmatprep.subr.bf16.mxu1 %v3257_v52 }
 0x3b5   : > { %2883 = vmatmul.mubr.f32.gmra.mrb[30].mxu1 %v3911_v44 }
 0x3b6   : > { %3260 = vmatpush3.bf16.msra.mxu1 %v3257_v52  ;;  %2917 = vmatprep.mubr.f32.mxu1 %v3916_v45  ;;  %v3334_v45 = vld [vmem:[%s3518_s12 + $0x8] sm:$0xff] }
 0x3b9   : > { %2918 = vmatmul.mubr.f32.vlgmr.msra.gmra.mrb[16].mxu1 %v3923_v46 }
 0x3ba   : > { %2920 = vmatprep.mubr.f32.mxu1 %v4337_v11 }
 0x3bd   : > { %2921 = vmatmul.mubr.f32.gmra.mrb[18].mxu1 %v4338_v48 }
 0x3be   : > { %2923 = vmatprep.mubr.f32.mxu1 %v4339_v15  ;;  %v3343_v15 = vld [vmem:[%s3518_s12 + $0x40] sm:$0xff] }
 0x3c1   : > { %2924 = vmatmul.mubr.f32.gmra.mrb[20].mxu1 %v4340_v4 }
 0x3c2   : > { %2926 = vmatprep.mubr.f32.mxu1 %v4341_v19 }
 0x3c5   : > { %2927 = vmatmul.mubr.f32.gmra.mrb[22].mxu1 %v4342_v22 }
 0x3c6   : > { %2929 = vmatprep.mubr.f32.mxu1 %v4343_v24 }
 0x3c9   : > { %2930 = vmatmul.mubr.f32.gmra.mrb[24].mxu1 %v4344_v27 }
 0x3ca   : > { %2932 = vmatprep.mubr.f32.mxu1 %v4345_v28  ;;  %v3344_v28 = vld [vmem:[%s3518_s12 + $0x58] sm:$0xff] }
 0x3cd   : > { %2933 = vmatmul.mubr.f32.gmra.mrb[26].mxu1 %v4346_v29 }
 0x3ce   : > { %2935 = vmatprep.mubr.f32.mxu1 %v4347_v31 }
 0x3d1   : > { %2936 = vmatmul.mubr.f32.gmra.mrb[28].mxu1 %v4348_v32 }
 0x3d2   : > { %2938 = vmatprep.mubr.f32.mxu1 %v4349_v33  ;;  %v3345_v33 = vld [vmem:[%s3518_s12 + $0x50] sm:$0xff] }
 0x3d5   : > { %2939 = vmatmul.mubr.f32.gmra.mrb[30].mxu1 %v4350_v34 }
 0x48c   : > { %v2919_v37 = vpop.f32.mrb[16].mxu1 }
 0x48d   : > { %v2059_v38 = vadd.f32 %v2919_v37, %v4239_v35  ;;  %v1956_v39 = vpop.f32.mrb[17].mxu1 }
 0x48e   : > { %v2058_v40 = vadd.f32 %v4239_v35, %v1956_v39 }
 0x48f   : > { %v2075_v41 = vmax.f32 %v2059_v38, 0.0 }
 0x490   : > { %v2074_v43 = vmax.f32 %v2058_v40, 0.0  ;;  %v2922_v44 = vpop.f32.mrb[18].mxu1 }
 0x491   : > { %v2091_v46 = vadd.f32 %v3334_v45, %v2075_v41  ;;  %v2061_v25 = vadd.f32 %v2922_v44, %v4239_v35  ;;  %v1966_v18 = vpop.f32.mrb[19].mxu1  ;;  %v3346_v41 = vld [vmem:[%s3518_s12 + $0x68] sm:$0xff] }
 0x492   : > { %v2090_v17 = vadd.f32 %v3335_v10, %v2074_v43  ;;  %v2060_v9 = vadd.f32 %v4239_v35, %v1966_v18 }
 0x493   : > { %2107 = vst [vmem:[%s4247_s20 + $0x8] sm:$0xff] %v2091_v46  ;;  %v2077_v14 = vmax.f32 %v2061_v25, 0.0  ;;  %v3347_v46 = vld [vmem:[%s3518_s12 + $0x60] sm:$0xff] }
 0x494   : > { %2106 = vst [vmem:[%s4247_s20] sm:$0xff] %v2090_v17  ;;  %v2076_v23 = vmax.f32 %v2060_v9, 0.0  ;;  %v2925_v2 = vpop.f32.mrb[20].mxu1  ;;  %v3348_v9 = vld [vmem:[%s3518_s12 + $0x78] sm:$0xff] }
 0x495   : > { %v2093_v21 = vadd.f32 %v3336_v5, %v2077_v14  ;;  %v2063_v0 = vadd.f32 %v2925_v2, %v4239_v35  ;;  %v1976_v53 = vpop.f32.mrb[21].mxu1 }
 0x496   : > { %v2092_v36 = vadd.f32 %v3337_v60, %v2076_v23  ;;  %v2062_v55 = vadd.f32 %v4239_v35, %v1976_v53  ;;  %v3349_v23 = vld [vmem:[%s3518_s12 + $0x70] sm:$0xff] }
 0x497   : > { %2109 = vst [vmem:[%s4247_s20 + $0x18] sm:$0xff] %v2093_v21  ;;  %v2079_v7 = vmax.f32 %v2063_v0, 0.0 }
 0x498   : > { %2108 = vst [vmem:[%s4247_s20 + $0x10] sm:$0xff] %v2092_v36  ;;  %v2078_v51 = vmax.f32 %v2062_v55, 0.0  ;;  %v2928_v30 = vpop.f32.mrb[22].mxu1 }
 0x499   : > { %v2095_v58 = vadd.f32 %v3338_v20, %v2079_v7  ;;  %v2065_v26 = vadd.f32 %v2928_v30, %v4239_v35  ;;  %v1986_v16 = vpop.f32.mrb[23].mxu1 }
 0x49a   : > { %v2094_v47 = vadd.f32 %v3339_v62, %v2078_v51  ;;  %v2064_v49 = vadd.f32 %v4239_v35, %v1986_v16 }
 0x49b   : > { %2111 = vst [vmem:[%s4247_s20 + $0x28] sm:$0xff] %v2095_v58  ;;  %v2081_v54 = vmax.f32 %v2065_v26, 0.0 }
 0x49c   : > { %2110 = vst [vmem:[%s4247_s20 + $0x20] sm:$0xff] %v2094_v47  ;;  %v2080_v8 = vmax.f32 %v2064_v49, 0.0  ;;  %v2931_v56 = vpop.f32.mrb[24].mxu1 }
 0x49d   : > { %v2097_v12 = vadd.f32 %v3340_v59, %v2081_v54  ;;  %v2067_v61 = vadd.f32 %v2931_v56, %v4239_v35  ;;  %v1996_v63 = vpop.f32.mrb[25].mxu1 }
 0x49e   : > { %v2096_v1 = vadd.f32 %v3341_v13, %v2080_v8  ;;  %v2066_v50 = vadd.f32 %v4239_v35, %v1996_v63 }
 0x49f   : > { %2113 = vst [vmem:[%s4247_s20 + $0x38] sm:$0xff] %v2097_v12  ;;  %v2083_v3 = vmax.f32 %v2067_v61, 0.0 }
 0x4a0   : > { %2112 = vst [vmem:[%s4247_s20 + $0x30] sm:$0xff] %v2096_v1  ;;  %v2082_v6 = vmax.f32 %v2066_v50, 0.0  ;;  %v2934_v57 = vpop.f32.mrb[26].mxu1 }
 0x4a1   : > { %v2099_v52 = vadd.f32 %v3342_v42, %v2083_v3  ;;  %v2069_v11 = vadd.f32 %v2934_v57, %v4239_v35  ;;  %v2006_v48 = vpop.f32.mrb[27].mxu1 }
 0x4a2   : > { %v2098_v4 = vadd.f32 %v3343_v15, %v2082_v6  ;;  %v2068_v19 = vadd.f32 %v4239_v35, %v2006_v48 }
 0x4a3   : > { %2115 = vst [vmem:[%s4247_s20 + $0x48] sm:$0xff] %v2099_v52  ;;  %v2085_v22 = vmax.f32 %v2069_v11, 0.0 }
 0x4a4   : > { %2114 = vst [vmem:[%s4247_s20 + $0x40] sm:$0xff] %v2098_v4  ;;  %v2084_v24 = vmax.f32 %v2068_v19, 0.0  ;;  %v2937_v27 = vpop.f32.mrb[28].mxu1 }
 0x4a5   : > { %v2101_v29 = vadd.f32 %v3344_v28, %v2085_v22  ;;  %v2071_v31 = vadd.f32 %v2937_v27, %v4239_v35  ;;  %v2016_v32 = vpop.f32.mrb[29].mxu1 }
 0x4a6   : > { %v2100_v34 = vadd.f32 %v3345_v33, %v2084_v24  ;;  %v2070_v37 = vadd.f32 %v4239_v35, %v2016_v32 }
 0x4a7   : > { %2117 = vst [vmem:[%s4247_s20 + $0x58] sm:$0xff] %v2101_v29  ;;  %v2087_v38 = vmax.f32 %v2071_v31, 0.0 }
 0x4a8   : > { %2116 = vst [vmem:[%s4247_s20 + $0x50] sm:$0xff] %v2100_v34  ;;  %v2086_v39 = vmax.f32 %v2070_v37, 0.0  ;;  %v2940_v40 = vpop.f32.mrb[30].mxu1 }
 0x4a9   : > { %v2103_v43 = vadd.f32 %v3346_v41, %v2087_v38  ;;  %v2073_v44 = vadd.f32 %v2940_v40, %v4239_v35  ;;  %v2026_v45 = vpop.f32.mrb[31].mxu1 }
 0x4aa   : > { %v2102_v25 = vadd.f32 %v3347_v46, %v2086_v39  ;;  %v2072_v18 = vadd.f32 %v4239_v35, %v2026_v45 }
 0x4ab   : > { %2119 = vst [vmem:[%s4247_s20 + $0x68] sm:$0xff] %v2103_v43  ;;  %v2089_v10 = vmax.f32 %v2073_v44, 0.0 }
 0x4ac   : > { %2118 = vst [vmem:[%s4247_s20 + $0x60] sm:$0xff] %v2102_v25  ;;  %v2088_v17 = vmax.f32 %v2072_v18, 0.0 }
 0x4ad   : > { %v2105_v14 = vadd.f32 %v3348_v9, %v2089_v10 }
 0x4ae   : > { %v2104_v2 = vadd.f32 %v3349_v23, %v2088_v17 }
 0x4af   : > { %2121 = vst [vmem:[%s4247_s20 + $0x78] sm:$0xff] %v2105_v14 }
 0x4b0   : > { %2120 = vst [vmem:[%s4247_s20 + $0x70] sm:$0xff] %v2104_v2 }
 0x4b1 PF: > { %s17_s24 = sadd.s32 1, %s3356_s24  }
 0x4b2   : > { %p14_p4 = scmp.ge.s32.totalorder %s17_s24, 4  }
 0x4b4   :  { %16 = sbr.rel (!%p14_p4) target bundleno = 1 (0x1), region = 83 }

</bundles_post_ra>
